<compile_context>
chip_gen: v6e
topology: v6e:2x2x1
jax: 0.10.0
libtpu: 0.0.40
codegen_flags: <defaults>
</compile_context>

<pallas_src>
import jax
import jax.numpy as jnp
from jax.experimental import pallas as pl
from jax.experimental.pallas import tpu as pltpu


def _round_up(a, b):
    return pl.cdiv(a, b) * b


# --------------------------------------------------------------------------- #
# Kernel 1: select_neighbors()  (LayerNorm -> MLP -> sigmoid -> bernoulli)
# --------------------------------------------------------------------------- #
def _edge_mask_kernel(xc_ref, w1t_ref, b1_ref, w2_ref, b2_ref, u_ref, mask_ref):
    x = xc_ref[...]                                        # [2C, TE]
    # nn.LayerNorm(2C), eps = 1e-5 (PyTorch default); affine folded into w1/b1.
    mu = jnp.mean(x, axis=0, keepdims=True)
    xc = x - mu
    var = jnp.mean(xc * xc, axis=0, keepdims=True)
    xn = xc * jax.lax.rsqrt(var + 1e-5)
    # Linear(2C, 64) + ReLU   (gamma folded into w1t, beta folded into b1)
    h = jnp.dot(w1t_ref[...], xn, preferred_element_type=jnp.float32) + b1_ref[...]
    h = jnp.maximum(h, 0.0)                                # [64, TE]
    # Linear(64, 1) as multiply + sublane reduction (avoids 1-column MXU matmul)
    s = jnp.sum(h * w2_ref[...], axis=0, keepdims=True) + b2_ref[...]   # [1, TE]
    p = jax.nn.sigmoid(s)
    # torch.bernoulli(p): uniforms are passed in lane-dense, compared elementwise
    mask_ref[...] = (u_ref[...] < p).astype(jnp.float32)


# --------------------------------------------------------------------------- #
# Kernel 2a: z = D^-1/2 (X W)   (row-tiled, computed once)
# --------------------------------------------------------------------------- #
def _xw_kernel(x_ref, w_ref, dinv_ref, z_ref):
    xw = jnp.dot(x_ref[...], w_ref[...], preferred_element_type=jnp.float32)
    z_ref[...] = (dinv_ref[...] * xw).astype(jnp.bfloat16)


# --------------------------------------------------------------------------- #
# Kernel 2b: out = D^-1/2 (A+I) z + b   (A row-blocks streamed, z resident)
# --------------------------------------------------------------------------- #
def _gcn_row_kernel(a_ref, z_ref, dinv_ref, b_ref, out_ref):
    acc = jnp.dot(a_ref[...], z_ref[...], preferred_element_type=jnp.float32)
    out_ref[...] = dinv_ref[...] * acc + b_ref[...]


# --------------------------------------------------------------------------- #
# Parameters (shapes per AdaptiveGCNLayer.__init__)
# --------------------------------------------------------------------------- #
def init_params(key, in_channels, out_channels):
    k1, k2, k3 = jax.random.split(key, 3)
    c2 = in_channels * 2
    return {
        "ln_gamma": jnp.ones((c2,), jnp.float32),          # nn.LayerNorm(2C) defaults
        "ln_beta": jnp.zeros((c2,), jnp.float32),
        "w1": jax.random.normal(k1, (c2, 64), jnp.float32) / jnp.sqrt(c2),
        "b1": jnp.zeros((64,), jnp.float32),
        "w2": jax.random.normal(k2, (64,), jnp.float32) / 8.0,
        "b2": jnp.zeros((), jnp.float32),
        "w_gcn": jax.random.normal(k3, (in_channels, out_channels), jnp.float32)
                 / jnp.sqrt(in_channels),
        "b_gcn": jnp.zeros((out_channels,), jnp.float32),
    }


# --------------------------------------------------------------------------- #
# Forward
# --------------------------------------------------------------------------- #
@jax.jit
def adaptive_gcn_forward(params, x, edge_index, key):
    N, C = x.shape
    E = edge_index.shape[1]
    Cout = params["w_gcn"].shape[1]
    row = edge_index[0]            # source
    col = edge_index[1]            # target

    # ---- padded / tiled sizes -------------------------------------------- #
    TE = min(512, _round_up(E, 128))          # edge tile (lane-dense)
    E_pad = _round_up(E, TE)
    TM = 256                                  # node row-block
    N_pad = _round_up(N, TM)
    Cout_pad = _round_up(Cout, 128)           # lane-dense GCN output

    const2 = lambda i: (0, 0)

    # ---- edge-selector kernel -------------------------------------------- #
    # Gather + concat endpoint features, transposed so edges sit on lanes.
    xT = x.T                                            # [C, N]
    xcat_t = jnp.concatenate([xT[:, row], xT[:, col]], axis=0)      # [2C, E]
    xcat_t = jnp.pad(xcat_t, ((0, 0), (0, E_pad - E)))

    # Fold LayerNorm affine into the first Linear: w1' = diag(gamma) @ w1,
    # b1' = beta @ w1 + b1 (host-side, tiny).
    w1t = (params["w1"] * params["ln_gamma"][:, None]).T            # [64, 2C]
    b1c = (params["ln_beta"] @ params["w1"] + params["b1"]).reshape(-1, 1)
    w2c = params["w2"].reshape(-1, 1)                               # [64, 1]
    b2c = params["b2"].reshape(1, 1)

    u = jax.random.uniform(key, (1, E_pad), jnp.float32)            # bernoulli draws

    mask_row = pl.pallas_call(
        _edge_mask_kernel,
        out_shape=jax.ShapeDtypeStruct((1, E_pad), jnp.float32),
        grid=(E_pad // TE,),
        in_specs=[
            pl.BlockSpec((2 * C, TE), lambda i: (0, i)),
            pl.BlockSpec((64, 2 * C), const2),
            pl.BlockSpec((64, 1), const2),
            pl.BlockSpec((64, 1), const2),
            pl.BlockSpec((1, 1), const2),
            pl.BlockSpec((1, TE), lambda i: (0, i)),
        ],
        out_specs=pl.BlockSpec((1, TE), lambda i: (0, i)),
        compiler_params=pltpu.CompilerParams(dimension_semantics=("parallel",)),
    )(xcat_t, w1t, b1c, w2c, b2c, u)
    m = mask_row[0, :E]                                  # [E] 0/1 neighbor mask

    # ---- GCNConv on the selected edges (dense, mask-weighted) ------------ #
    # Degree (with fused self-loop) and symmetric normalization.
    deg = jnp.zeros((N_pad,), jnp.float32).at[col].add(m) + 1.0
    dinv = jax.lax.rsqrt(deg).reshape(N_pad, 1)

    # Masked adjacency (messages src -> dst) + self loops, exact in bf16.
    mb = m.astype(jnp.bfloat16)
    a_hat = jnp.zeros((N_pad, N_pad), jnp.bfloat16)
    a_hat = a_hat.at[col, row].add(mb)
    diag = jnp.arange(N)
    a_hat = a_hat.at[diag, diag].add(jnp.ones((N,), jnp.bfloat16))

    # Pad X / W / b to lane-dense output channels.
    x_pad = jnp.pad(x, ((0, N_pad - N), (0, 0)))
    w_pad = jnp.zeros((C, Cout_pad), jnp.float32).at[:, :Cout].set(params["w_gcn"])
    b_pad = jnp.zeros((1, Cout_pad), jnp.float32).at[:, :Cout].set(
        params["b_gcn"].reshape(1, -1))

    # z = D^-1/2 X W  (computed once, row-tiled)
    z = pl.pallas_call(
        _xw_kernel,
        out_shape=jax.ShapeDtypeStruct((N_pad, Cout_pad), jnp.bfloat16),
        grid=(N_pad // TM,),
        in_specs=[
            pl.BlockSpec((TM, C), lambda i: (i, 0)),
            pl.BlockSpec((C, Cout_pad), const2),
            pl.BlockSpec((TM, 1), lambda i: (i, 0)),
        ],
        out_specs=pl.BlockSpec((TM, Cout_pad), lambda i: (i, 0)),
        compiler_params=pltpu.CompilerParams(dimension_semantics=("parallel",)),
    )(x_pad, w_pad, dinv)

    # out = D^-1/2 (A+I) z + b  (stream bf16 A row-blocks, z resident)
    out_full = pl.pallas_call(
        _gcn_row_kernel,
        out_shape=jax.ShapeDtypeStruct((N_pad, Cout_pad), jnp.float32),
        grid=(N_pad // TM,),
        in_specs=[
            pl.BlockSpec((TM, N_pad), lambda i: (i, 0)),
            pl.BlockSpec((N_pad, Cout_pad), const2),
            pl.BlockSpec((TM, 1), lambda i: (i, 0)),
            pl.BlockSpec((1, Cout_pad), const2),
        ],
        out_specs=pl.BlockSpec((TM, Cout_pad), lambda i: (i, 0)),
        compiler_params=pltpu.CompilerParams(dimension_semantics=("parallel",)),
    )(a_hat, z, dinv, b_pad)

    out = out_full[:N, :Cout]
    return out, m


if __name__ == "__main__":
    key = jax.random.PRNGKey(0)
    k_param, k_x, k_e, k_bern = jax.random.split(key, 4)

    N, C_in, C_out, E = 16, 8, 8, 32
    params = init_params(k_param, C_in, C_out)
    x = jax.random.normal(k_x, (N, C_in), jnp.float32)
    edge_index = jax.random.randint(k_e, (2, E), 0, N, dtype=jnp.int32)

    out, mask = adaptive_gcn_forward(params, x, edge_index, k_bern)
    jax.block_until_ready(out)
    assert out.shape == (N, C_out) and mask.shape == (E,)
    assert bool(jnp.all(jnp.isfinite(out)))
    assert bool(jnp.all((mask == 0.0) | (mask == 1.0)))
    print("KERNEL_OK")
</pallas_src>

<mosaic_0001>
module attributes {stable_mosaic.version = 11 : i64} {
  func.func private @main(%arg0: i32) attributes {dimension_semantics = [#tpu.dimension_semantics<core_parallel>], iteration_bounds = array<i64: 2>, tpu.core_type = #tpu.core_type<sc_scalar_subcore>, window_params = []} {
    return
  }
}

module attributes {stable_mosaic.version = 11 : i64} {
  func.func private @main(%arg0: i32) attributes {dimension_semantics = [#tpu.dimension_semantics<core_parallel>], iteration_bounds = array<i64: 2>, tpu.core_type = #tpu.core_type<sc_scalar_subcore>, window_params = []} {
    return
  }
}

module attributes {stable_mosaic.version = 11 : i64} {
  func.func @_edge_mask_kernel(%arg0: i32, %arg1: memref<16x128xf32, #tpu.memory_space<vmem>>, %arg2: memref<64x16xf32, #tpu.memory_space<vmem>>, %arg3: memref<64x1xf32, #tpu.memory_space<vmem>>, %arg4: memref<64x1xf32, #tpu.memory_space<vmem>>, %arg5: memref<1x1xf32, #tpu.memory_space<vmem>>, %arg6: memref<1x128xf32, #tpu.memory_space<vmem>>, %arg7: memref<1x128xf32, #tpu.memory_space<vmem>>) attributes {dimension_semantics = [#tpu.dimension_semantics<parallel>], iteration_bounds = array<i64: 1>, scalar_prefetch = 0 : i64, scratch_operands = 0 : i64, tpu.core_type = #tpu.core_type<tc>, window_params = [{transform_indices = @transform_0, window_bounds = array<i64: 16, 128>}, {pipeline_mode = #tpu.pipeline_mode<synchronous>, transform_indices = @transform_1, window_bounds = array<i64: 64, 16>}, {pipeline_mode = #tpu.pipeline_mode<synchronous>, transform_indices = @transform_2, window_bounds = array<i64: 64, 1>}, {pipeline_mode = #tpu.pipeline_mode<synchronous>, transform_indices = @transform_3, window_bounds = array<i64: 64, 1>}, {pipeline_mode = #tpu.pipeline_mode<synchronous>, transform_indices = @transform_4, window_bounds = array<i64: 1, 1>}, {transform_indices = @transform_5, window_bounds = array<i64: 1, 128>}, {transform_indices = @transform_6, window_bounds = array<i64: 1, 128>}]} {
    %c0 = arith.constant 0 : index
    %c0_0 = arith.constant 0 : index
    %0 = vector.load %arg1[%c0, %c0_0] : memref<16x128xf32, #tpu.memory_space<vmem>>, vector<16x128xf32>
    %cst = arith.constant dense<0.000000e+00> : vector<128xf32>
    %1 = vector.multi_reduction <add>, %0, %cst [0] : vector<16x128xf32> to vector<128xf32>
    %2 = vector.shape_cast %1 : vector<128xf32> to vector<1x128xf32>
    %cst_1 = arith.constant 1.600000e+01 : f32
    %3 = vector.broadcast %cst_1 : f32 to vector<1x128xf32>
    %4 = arith.divf %2, %3 : vector<1x128xf32>
    %5 = vector.broadcast %4 : vector<1x128xf32> to vector<16x128xf32>
    %6 = arith.subf %0, %5 : vector<16x128xf32>
    %7 = arith.mulf %6, %6 : vector<16x128xf32>
    %cst_2 = arith.constant dense<0.000000e+00> : vector<128xf32>
    %8 = vector.multi_reduction <add>, %7, %cst_2 [0] : vector<16x128xf32> to vector<128xf32>
    %9 = vector.shape_cast %8 : vector<128xf32> to vector<1x128xf32>
    %cst_3 = arith.constant 1.600000e+01 : f32
    %10 = vector.broadcast %cst_3 : f32 to vector<1x128xf32>
    %11 = arith.divf %9, %10 : vector<1x128xf32>
    %cst_4 = arith.constant 9.99999974E-6 : f32
    %12 = vector.broadcast %cst_4 : f32 to vector<1x128xf32>
    %13 = arith.addf %11, %12 : vector<1x128xf32>
    %14 = math.rsqrt %13 : vector<1x128xf32>
    %15 = vector.broadcast %14 : vector<1x128xf32> to vector<16x128xf32>
    %16 = arith.mulf %6, %15 : vector<16x128xf32>
    %c0_5 = arith.constant 0 : index
    %c0_6 = arith.constant 0 : index
    %17 = vector.load %arg2[%c0_5, %c0_6] : memref<64x16xf32, #tpu.memory_space<vmem>>, vector<64x16xf32>
    %cst_7 = arith.constant dense<0.000000e+00> : vector<64x128xf32>
    %18 = tpu.matmul %17, %16, %cst_7 {dimension_numbers = #tpu.dot_dimension_numbers<[1], [0], [0], [1], [0, 0, 1, 1], [], []>} : vector<64x16xf32>, vector<16x128xf32>, vector<64x128xf32> -> vector<64x128xf32>
    %c0_8 = arith.constant 0 : index
    %c0_9 = arith.constant 0 : index
    %19 = vector.load %arg3[%c0_8, %c0_9] : memref<64x1xf32, #tpu.memory_space<vmem>>, vector<64x1xf32>
    %20 = vector.broadcast %19 : vector<64x1xf32> to vector<64x128xf32>
    %21 = arith.addf %18, %20 : vector<64x128xf32>
    %cst_10 = arith.constant 0.000000e+00 : f32
    %22 = vector.broadcast %cst_10 : f32 to vector<64x128xf32>
    %23 = arith.maximumf %21, %22 : vector<64x128xf32>
    %c0_11 = arith.constant 0 : index
    %c0_12 = arith.constant 0 : index
    %24 = vector.load %arg4[%c0_11, %c0_12] : memref<64x1xf32, #tpu.memory_space<vmem>>, vector<64x1xf32>
    %25 = vector.broadcast %24 : vector<64x1xf32> to vector<64x128xf32>
    %26 = arith.mulf %23, %25 : vector<64x128xf32>
    %cst_13 = arith.constant dense<0.000000e+00> : vector<128xf32>
    %27 = vector.multi_reduction <add>, %26, %cst_13 [0] : vector<64x128xf32> to vector<128xf32>
    %28 = vector.shape_cast %27 : vector<128xf32> to vector<1x128xf32>
    %c0_14 = arith.constant 0 : index
    %c0_15 = arith.constant 0 : index
    %29 = vector.load %arg5[%c0_14, %c0_15] : memref<1x1xf32, #tpu.memory_space<vmem>>, vector<1x1xf32>
    %30 = vector.broadcast %29 : vector<1x1xf32> to vector<1x128xf32>
    %31 = arith.addf %28, %30 : vector<1x128xf32>
    %32 = arith.negf %31 : vector<1x128xf32>
    %33 = math.exp %32 : vector<1x128xf32>
    %cst_16 = arith.constant 1.000000e+00 : f32
    %34 = vector.broadcast %cst_16 : f32 to vector<1x128xf32>
    %35 = arith.addf %34, %33 : vector<1x128xf32>
    %36 = arith.divf %34, %35 : vector<1x128xf32>
    %c0_17 = arith.constant 0 : index
    %c0_18 = arith.constant 0 : index
    %37 = vector.load %arg6[%c0_17, %c0_18] : memref<1x128xf32, #tpu.memory_space<vmem>>, vector<1x128xf32>
    %38 = arith.cmpf olt, %37, %36 : vector<1x128xf32>
    %39 = arith.extui %38 : vector<1x128xi1> to vector<1x128xi32>
    %40 = arith.sitofp %39 : vector<1x128xi32> to vector<1x128xf32>
    %c0_19 = arith.constant 0 : index
    %c0_20 = arith.constant 0 : index
    %41 = vector.load %arg7[%c0_19, %c0_20] : memref<1x128xf32, #tpu.memory_space<vmem>>, vector<1x128xf32>
    tpu.vector_store %arg7[%c0_19, %c0_20], %40 {strides = array<i32>} : memref<1x128xf32, #tpu.memory_space<vmem>>, vector<1x128xf32>,
    return
  }
  func.func @transform_0(%arg0: i32) -> (i32, i32) {
    %c0_i32 = arith.constant 0 : i32
    %c0_i32_0 = arith.constant 0 : i32
    return %c0_i32, %arg0 : i32, i32
  }
  func.func @transform_1(%arg0: i32) -> (i32, i32) {
    %c0_i32 = arith.constant 0 : i32
    %c0_i32_0 = arith.constant 0 : i32
    %c0_i32_1 = arith.constant 0 : i32
    return %c0_i32, %c0_i32_0 : i32, i32
  }
  func.func @transform_2(%arg0: i32) -> (i32, i32) {
    %c0_i32 = arith.constant 0 : i32
    %c0_i32_0 = arith.constant 0 : i32
    %c0_i32_1 = arith.constant 0 : i32
    return %c0_i32, %c0_i32_0 : i32, i32
  }
  func.func @transform_3(%arg0: i32) -> (i32, i32) {
    %c0_i32 = arith.constant 0 : i32
    %c0_i32_0 = arith.constant 0 : i32
    %c0_i32_1 = arith.constant 0 : i32
    return %c0_i32, %c0_i32_0 : i32, i32
  }
  func.func @transform_4(%arg0: i32) -> (i32, i32) {
    %c0_i32 = arith.constant 0 : i32
    %c0_i32_0 = arith.constant 0 : i32
    %c0_i32_1 = arith.constant 0 : i32
    return %c0_i32, %c0_i32_0 : i32, i32
  }
  func.func @transform_5(%arg0: i32) -> (i32, i32) {
    %c0_i32 = arith.constant 0 : i32
    %c0_i32_0 = arith.constant 0 : i32
    return %c0_i32, %arg0 : i32, i32
  }
  func.func @transform_6(%arg0: i32) -> (i32, i32) {
    %c0_i32 = arith.constant 0 : i32
    %c0_i32_0 = arith.constant 0 : i32
    return %c0_i32, %arg0 : i32, i32
  }
}

module attributes {stable_mosaic.version = 11 : i64} {
  func.func @_xw_kernel(%arg0: i32, %arg1: memref<256x8xf32, #tpu.memory_space<vmem>>, %arg2: memref<8x128xf32, #tpu.memory_space<vmem>>, %arg3: memref<256x1xf32, #tpu.memory_space<vmem>>, %arg4: memref<256x128xbf16, #tpu.memory_space<vmem>>) attributes {dimension_semantics = [#tpu.dimension_semantics<parallel>], iteration_bounds = array<i64: 1>, scalar_prefetch = 0 : i64, scratch_operands = 0 : i64, tpu.core_type = #tpu.core_type<tc>, window_params = [{transform_indices = @transform_0, window_bounds = array<i64: 256, 8>}, {pipeline_mode = #tpu.pipeline_mode<synchronous>, transform_indices = @transform_1, window_bounds = array<i64: 8, 128>}, {transform_indices = @transform_2, window_bounds = array<i64: 256, 1>}, {transform_indices = @transform_3, window_bounds = array<i64: 256, 128>}]} {
    %c0 = arith.constant 0 : index
    %c0_0 = arith.constant 0 : index
    %0 = vector.load %arg1[%c0, %c0_0] : memref<256x8xf32, #tpu.memory_space<vmem>>, vector<256x8xf32>
    %c0_1 = arith.constant 0 : index
    %c0_2 = arith.constant 0 : index
    %1 = vector.load %arg2[%c0_1, %c0_2] : memref<8x128xf32, #tpu.memory_space<vmem>>, vector<8x128xf32>
    %cst = arith.constant dense<0.000000e+00> : vector<256x128xf32>
    %2 = tpu.matmul %0, %1, %cst {dimension_numbers = #tpu.dot_dimension_numbers<[1], [0], [0], [1], [0, 0, 1, 1], [], []>} : vector<256x8xf32>, vector<8x128xf32>, vector<256x128xf32> -> vector<256x128xf32>
    %c0_3 = arith.constant 0 : index
    %c0_4 = arith.constant 0 : index
    %3 = vector.load %arg3[%c0_3, %c0_4] : memref<256x1xf32, #tpu.memory_space<vmem>>, vector<256x1xf32>
    %4 = vector.broadcast %3 : vector<256x1xf32> to vector<256x128xf32>
    %5 = arith.mulf %4, %2 : vector<256x128xf32>
    %6 = arith.truncf %5 : vector<256x128xf32> to vector<256x128xbf16>
    %c0_5 = arith.constant 0 : index
    %c0_6 = arith.constant 0 : index
    %7 = vector.load %arg4[%c0_5, %c0_6] : memref<256x128xbf16, #tpu.memory_space<vmem>>, vector<256x128xbf16>
    tpu.vector_store %arg4[%c0_5, %c0_6], %6 {strides = array<i32>} : memref<256x128xbf16, #tpu.memory_space<vmem>>, vector<256x128xbf16>,
    return
  }
  func.func @transform_0(%arg0: i32) -> (i32, i32) {
    %c0_i32 = arith.constant 0 : i32
    %c0_i32_0 = arith.constant 0 : i32
    return %arg0, %c0_i32 : i32, i32
  }
  func.func @transform_1(%arg0: i32) -> (i32, i32) {
    %c0_i32 = arith.constant 0 : i32
    %c0_i32_0 = arith.constant 0 : i32
    %c0_i32_1 = arith.constant 0 : i32
    return %c0_i32, %c0_i32_0 : i32, i32
  }
  func.func @transform_2(%arg0: i32) -> (i32, i32) {
    %c0_i32 = arith.constant 0 : i32
    %c0_i32_0 = arith.constant 0 : i32
    return %arg0, %c0_i32 : i32, i32
  }
  func.func @transform_3(%arg0: i32) -> (i32, i32) {
    %c0_i32 = arith.constant 0 : i32
    %c0_i32_0 = arith.constant 0 : i32
    return %arg0, %c0_i32 : i32, i32
  }
}

module attributes {stable_mosaic.version = 11 : i64} {
  func.func @_gcn_row_kernel(%arg0: i32, %arg1: memref<256x256xbf16, #tpu.memory_space<vmem>>, %arg2: memref<256x128xbf16, #tpu.memory_space<vmem>>, %arg3: memref<256x1xf32, #tpu.memory_space<vmem>>, %arg4: memref<1x128xf32, #tpu.memory_space<vmem>>, %arg5: memref<256x128xf32, #tpu.memory_space<vmem>>) attributes {dimension_semantics = [#tpu.dimension_semantics<parallel>], iteration_bounds = array<i64: 1>, scalar_prefetch = 0 : i64, scratch_operands = 0 : i64, tpu.core_type = #tpu.core_type<tc>, window_params = [{transform_indices = @transform_0, window_bounds = array<i64: 256, 256>}, {pipeline_mode = #tpu.pipeline_mode<synchronous>, transform_indices = @transform_1, window_bounds = array<i64: 256, 128>}, {transform_indices = @transform_2, window_bounds = array<i64: 256, 1>}, {pipeline_mode = #tpu.pipeline_mode<synchronous>, transform_indices = @transform_3, window_bounds = array<i64: 1, 128>}, {transform_indices = @transform_4, window_bounds = array<i64: 256, 128>}]} {
    %c0 = arith.constant 0 : index
    %c0_0 = arith.constant 0 : index
    %0 = vector.load %arg1[%c0, %c0_0] : memref<256x256xbf16, #tpu.memory_space<vmem>>, vector<256x256xbf16>
    %c0_1 = arith.constant 0 : index
    %c0_2 = arith.constant 0 : index
    %1 = vector.load %arg2[%c0_1, %c0_2] : memref<256x128xbf16, #tpu.memory_space<vmem>>, vector<256x128xbf16>
    %cst = arith.constant dense<0.000000e+00> : vector<256x128xf32>
    %2 = tpu.matmul %0, %1, %cst {dimension_numbers = #tpu.dot_dimension_numbers<[1], [0], [0], [1], [0, 0, 1, 1], [], []>} : vector<256x256xbf16>, vector<256x128xbf16>, vector<256x128xf32> -> vector<256x128xf32>
    %c0_3 = arith.constant 0 : index
    %c0_4 = arith.constant 0 : index
    %3 = vector.load %arg3[%c0_3, %c0_4] : memref<256x1xf32, #tpu.memory_space<vmem>>, vector<256x1xf32>
    %4 = vector.broadcast %3 : vector<256x1xf32> to vector<256x128xf32>
    %5 = arith.mulf %4, %2 : vector<256x128xf32>
    %c0_5 = arith.constant 0 : index
    %c0_6 = arith.constant 0 : index
    %6 = vector.load %arg4[%c0_5, %c0_6] : memref<1x128xf32, #tpu.memory_space<vmem>>, vector<1x128xf32>
    %7 = vector.broadcast %6 : vector<1x128xf32> to vector<256x128xf32>
    %8 = arith.addf %5, %7 : vector<256x128xf32>
    %c0_7 = arith.constant 0 : index
    %c0_8 = arith.constant 0 : index
    %9 = vector.load %arg5[%c0_7, %c0_8] : memref<256x128xf32, #tpu.memory_space<vmem>>, vector<256x128xf32>
    tpu.vector_store %arg5[%c0_7, %c0_8], %8 {strides = array<i32>} : memref<256x128xf32, #tpu.memory_space<vmem>>, vector<256x128xf32>,
    return
  }
  func.func @transform_0(%arg0: i32) -> (i32, i32) {
    %c0_i32 = arith.constant 0 : i32
    %c0_i32_0 = arith.constant 0 : i32
    return %arg0, %c0_i32 : i32, i32
  }
  func.func @transform_1(%arg0: i32) -> (i32, i32) {
    %c0_i32 = arith.constant 0 : i32
    %c0_i32_0 = arith.constant 0 : i32
    %c0_i32_1 = arith.constant 0 : i32
    return %c0_i32, %c0_i32_0 : i32, i32
  }
  func.func @transform_2(%arg0: i32) -> (i32, i32) {
    %c0_i32 = arith.constant 0 : i32
    %c0_i32_0 = arith.constant 0 : i32
    return %arg0, %c0_i32 : i32, i32
  }
  func.func @transform_3(%arg0: i32) -> (i32, i32) {
    %c0_i32 = arith.constant 0 : i32
    %c0_i32_0 = arith.constant 0 : i32
    %c0_i32_1 = arith.constant 0 : i32
    return %c0_i32, %c0_i32_0 : i32, i32
  }
  func.func @transform_4(%arg0: i32) -> (i32, i32) {
    %c0_i32 = arith.constant 0 : i32
    %c0_i32_0 = arith.constant 0 : i32
    return %arg0, %c0_i32 : i32, i32
  }
}

</mosaic_0001>

<bundles_post_ra>
// kernel: adaptive_gcn_forward.3
= control target key start
LH: loop header
LB: loop body
LE: loop exit
PB: predicated region body
PF: predicated region fallthrough
CT: control target
= control target key end

     0   :  { %vm108_vm0 = vcmask 130048   ;;  %v391_v3 = vmov 0   ;;  %s523_s0 = inlined_call_operand.vmem [shape: f32[16,128], index: 0, kind: input, shape index: {}]   ;;  %s524_s1 = inlined_call_operand.vmem [shape: f32[64,16], index: 1, kind: input, shape index: {}]   ;;  %s525_s4 = inlined_call_operand.<no memory space> [shape: f32[1,1], index: 4, kind: input, shape index: {}]   ;;  %s526_s2 = inlined_call_operand.vmem [shape: f32[64,1], index: 2, kind: input, shape index: {}]   ;;  %s527_s3 = inlined_call_operand.vmem [shape: f32[64,1], index: 3, kind: input, shape index: {}]   ;;  %s528_s5 = inlined_call_operand.vmem [shape: f32[1,128], index: 5, kind: input, shape index: {}]   ;;  %s529_s6 = inlined_call_operand.vmem [shape: f32[1,128], index: 6, kind: output, shape index: {}]  }
   0x1   :  { %v25_v0 = vld [vmem:[%s523_s0] sm:$0xff]  ;;  %v26_v1 = vld [vmem:[%s523_s0 + $0x8] sm:$0xff]  ;;  %383 = vset.pattern.permute.xlu0 %v391_v3  ;;  %384 = vset.pattern.permute.xlu1 %v391_v3  ;;  %v11_v4 = vstv %s525_s4  ;;  %v62_v9 = vld [vmem:[%s526_s2 + $0x10] sm:$0xff] }
   0x2   :  { %v52_v2 = vld [vmem:[%s524_s1] sm:$0xff]  ;;  %v27_v5 = vadd.f32 %v26_v1, %v25_v0  ;;  %12 = vst [vmem:[#allocation2] sm:$0x1] %v11_v4  ;;  %v61_v11 = vld [vmem:[%s526_s2 + $0x8] sm:$0xff]  ;;  %80 = vperm.xlu1 %384, %v62_v9   ;;  %v63_v12 = vld [vmem:[%s526_s2 + $0x18] sm:$0xff] }
   0x3   :  { %365 = vmatprep.mubr.msk.f32.mxu0 %vm108_vm0, %v52_v2  ;;  %v56_v6 = vld [vmem:[%s524_s1 + $0x20] sm:$0xff]  ;;  %v247_v16 = vld [vmem:[%s527_s3 + $0x8] sm:$0xff]  ;;  %v248_v20 = vld [vmem:[%s527_s3 + $0x10] sm:$0xff] }
   0x4   :  { %371 = vmatprep.mubr.msk.f32.mxu1 %vm108_vm0, %v56_v6  ;;  %v28_v7 = vrot.slane %v27_v5, 4  ;;  %v60_v8 = vld [vmem:[%s526_s2] sm:$0xff]  ;;  %v65_v24 = vld [vmem:[%s526_s2 + $0x28] sm:$0xff]  ;;  %v249_v25 = vld [vmem:[%s527_s3 + $0x18] sm:$0xff] }
   0x5   :  { %70 = vperm.xlu0 %383, %v60_v8   ;;  %v246_v15 = vld [vmem:[%s527_s3] sm:$0xff]  ;;  %v66_v29 = vld [vmem:[%s526_s2 + $0x30] sm:$0xff]  ;;  %v67_v33 = vld [vmem:[%s526_s2 + $0x38] sm:$0xff] }
   0x6   :  { %v29_v10 = vadd.f32 %v28_v7, %v27_v5  ;;  %85 = vperm.xlu1 %384, %v63_v12   ;;  %v64_v19 = vld [vmem:[%s526_s2 + $0x20] sm:$0xff]  ;;  %v251_v34 = vld [vmem:[%s527_s3 + $0x28] sm:$0xff]  ;;  %v252_v37 = vld [vmem:[%s527_s3 + $0x30] sm:$0xff] }
   0x7   :  { %v250_v30 = vld [vmem:[%s527_s3 + $0x20] sm:$0xff]  ;;  %v253_v38 = vld [vmem:[%s527_s3 + $0x38] sm:$0xff]  ;;  %v53_v47 = vld [vmem:[%s524_s1 + $0x8] sm:$0xff] }
   0x8   :  { %v30_v13 = vrot.slane %v29_v10, 2  ;;  %v57_v48 = vld [vmem:[%s524_s1 + $0x28] sm:$0xff]  ;;  %v54_v49 = vld [vmem:[%s524_s1 + $0x10] sm:$0xff]  ;;  %v55_v51 = vld [vmem:[%s524_s1 + $0x18] sm:$0xff] }
   0x9   :  { %75 = vperm.xlu0 %383, %v61_v11   ;;  %v315_v41 = vld [vmem:[#allocation2] sm:$0x1]  ;;  %v58_v50 = vld [vmem:[%s524_s1 + $0x30] sm:$0xff]  ;;  %v59_v52 = vld [vmem:[%s524_s1 + $0x38] sm:$0xff] }
   0xa   :  { %v31_v14 = vadd.f32 %v30_v13, %v29_v10  ;;  %261 = vperm.xlu1 %384, %v247_v16  }
   0xc   :  { %v32_v17 = vrot.slane %v31_v14, 1 }
   0xd   :  { %256 = vperm.xlu0 %383, %v246_v15  }
   0xe   :  { %v33_v18 = vadd.f32 %v32_v17, %v31_v14  ;;  %266 = vperm.xlu1 %384, %v248_v20  }
  0x10   :  { %v35_v21 = vmul.f32 0.0625, %v33_v18 }
  0x11   :  { %90 = vperm.xlu0 %383, %v64_v19  }
  0x12   :  { %v36_v22 = vsub.f32 %v25_v0, %v35_v21  ;;  %v37_v23 = vsub.f32 %v26_v1, %v35_v21  ;;  %271 = vperm.xlu1 %384, %v249_v25  }
  0x14   :  { %v38_v26 = vmul.f32 %v36_v22, %v36_v22  ;;  %v39_v27 = vmul.f32 %v37_v23, %v37_v23 }
  0x15   :  { %95 = vperm.xlu0 %383, %v65_v24  }
  0x16   :  { %v40_v28 = vadd.f32 %v39_v27, %v38_v26  ;;  %276 = vperm.xlu1 %384, %v250_v30  }
  0x18   :  { %v41_v31 = vrot.slane %v40_v28, 4 }
  0x19   :  { %100 = vperm.xlu0 %383, %v66_v29  }
  0x1a   :  { %v42_v32 = vadd.f32 %v41_v31, %v40_v28  ;;  %281 = vperm.xlu1 %384, %v251_v34  }
  0x1c   :  { %v43_v35 = vrot.slane %v42_v32, 2 }
  0x1d   :  { %105 = vperm.xlu0 %383, %v67_v33  }
  0x1e   :  { %v44_v36 = vadd.f32 %v43_v35, %v42_v32  ;;  %291 = vperm.xlu1 %384, %v253_v38  }
  0x20   :  { %v45_v39 = vrot.slane %v44_v36, 1 }
  0x21   :  { %286 = vperm.xlu0 %383, %v252_v37  }
  0x22   :  { %v46_v40 = vadd.f32 %v45_v39, %v44_v36 }
  0x24   :  { %v47_v42 = vmul.f32 0.0625, %v46_v40 }
  0x25   :  { %318 = vperm.xlu0 %383, %v315_v41  }
  0x26   :  { %v48_v43 = vadd.f32 1e-05, %v47_v42 }
  0x28   :  { %385 = vrsqrt.f32 %v48_v43  ;;  %v321_v43 = vlaneseq }
  0x35   :  { %v386_v44 = vpop.eup %385 }
  0x36   :  { %v51_v45 = vmul.f32 %v386_v44, %v37_v23  ;;  %v50_v46 = vmul.f32 %v386_v44, %v36_v22 }
  0x38   :  { %361 = vmatprep.subr.mxu0 %v51_v45  ;;  %377 = vmatprep.subr.mxu1 %v51_v45 }
  0x39   :  { %362 = vmatpush3.msra.mxu0 %v51_v45  ;;  %379 = vmatpush3.msra.mxu1 %v51_v45 }
  0x3a   :  { %363 = vmatprep.subr.mxu0 %v50_v46  ;;  %378 = vmatprep.subr.mxu1 %v50_v46 }
  0x3b   :  { %364 = vmatpush3.msra.mxu0 %v50_v46  ;;  %380 = vmatpush3.msra.mxu1 %v50_v46  ;;  %v322_v46 = vshrl.u32 %v321_v43, 7 }
  0x3c   :  { %366 = vmatmul.mubr.msk.f32.vlgmr.msra.gmra.mxu0 %vm108_vm0, %v53_v47  ;;  %372 = vmatmul.mubr.msk.f32.vlgmr.msra.gmra.mxu1 %vm108_vm0, %v57_v48 }
  0x3d   :  { %368 = vmatprep.mubr.msk.f32.mxu0 %vm108_vm0, %v54_v49  ;;  %374 = vmatprep.mubr.msk.f32.mxu1 %vm108_vm0, %v58_v50  ;;  %v323_v49 = vsub.s32 0, %v322_v46 }
  0x40   :  { %369 = vmatmul.mubr.msk.f32.gmra.mxu0 %vm108_vm0, %v55_v51  ;;  %375 = vmatmul.mubr.msk.f32.gmra.mxu1 %vm108_vm0, %v59_v52 }
  0x7d   :  { %v81_v54 = vpop.permute.xlu1 %80 }
  0x80   :  { %v71_v53 = vpop.permute.xlu0 %70 }
  0x81   :  { %v86_v56 = vpop.permute.xlu1 %85 }
  0x84   :  { %v76_v55 = vpop.permute.xlu0 %75 }
  0x85   :  { %v262_v58 = vpop.permute.xlu1 %261 }
  0x88   :  { %v257_v57 = vpop.permute.xlu0 %256 }
  0x89   :  { %v267_v60 = vpop.permute.xlu1 %266 }
  0x8c   :  { %v91_v59 = vpop.permute.xlu0 %90 }
  0x8d   :  { %v272_v0 = vpop.permute.xlu1 %271 }
  0x90   :  { %v96_v61 = vpop.permute.xlu0 %95 }
  0x91   :  { %v277_v15 = vpop.permute.xlu1 %276 }
  0x94   :  { %v101_v9 = vpop.permute.xlu0 %100 }
  0x95   :  { %v282_v30 = vpop.permute.xlu1 %281 }
  0x98   :  { %v106_v25 = vpop.permute.xlu0 %105 }
  0x99   :  { %v292_v40 = vpop.permute.xlu1 %291 }
  0x9c   :  { %v287_v37 = vpop.permute.xlu0 %286 }
  0xa0   :  { %v319_v51 = vpop.permute.xlu0 %318 }
  0xfc   :  { %v367_v62 = vpop.f32.mrf.mxu0  ;;  %v373_v63 = vpop.f32.mrf.mxu1 }
  0xfd   :  { %v205_v1 = vadd.f32 %v367_v62, %v76_v55  ;;  %v225_v18 = vadd.f32 %v373_v63, %v96_v61  ;;  %v392_v61 = vmov 0.0  }
  0xfe   :  { %v199_v2 = vpop.f32.mrf.mxu0  ;;  %v219_v3 = vpop.f32.mrf.mxu1 }
  0xff   :  { %v200_v4 = vadd.f32 %v199_v2, %v71_v53  ;;  %v239_v7 = vmax.f32 %v205_v1, 0.0  ;;  %v220_v13 = vadd.f32 %v219_v3, %v91_v59  ;;  %v243_v26 = vmax.f32 %v225_v18, 0.0  ;;  %v332_v59 = vld [vmem:[%s528_s5] sm:$0x1] }
 0x100   :  { %v370_v5 = vpop.f32.mrf.mxu0  ;;  %v376_v6 = vpop.f32.mrf.mxu1  ;;  %v324_v53 = vrot.slane %v319_v51, %v323_v49 }
 0x101   :  { %v238_v8 = vmax.f32 %v200_v4, 0.0  ;;  %v215_v10 = vadd.f32 %v370_v5, %v86_v56  ;;  %v295_v17 = vmul.f32 %v262_v58, %v239_v7  ;;  %v242_v22 = vmax.f32 %v220_v13, 0.0 }
 0x102   :  { %v209_v11 = vpop.f32.mrf.mxu0  ;;  %v229_v16 = vpop.f32.mrf.mxu1  ;;  %v235_v28 = vadd.f32 %v376_v6, %v106_v25  ;;  %v299_v34 = vmul.f32 %v282_v30, %v243_v26 }
 0x103   :  { %v294_v12 = vmul.f32 %v257_v57, %v238_v8  ;;  %v210_v14 = vadd.f32 %v209_v11, %v81_v54  ;;  %v241_v19 = vmax.f32 %v215_v10, 0.0  ;;  %v230_v24 = vadd.f32 %v229_v16, %v101_v9 }
 0x104   :  { %v298_v31 = vmul.f32 %v277_v15, %v242_v22  ;;  %v245_v35 = vmax.f32 %v235_v28, 0.0 }
 0x105   :  { %v240_v20 = vmax.f32 %v210_v14, 0.0  ;;  %v302_v21 = vadd.f32 %v295_v17, %v294_v12  ;;  %v297_v27 = vmul.f32 %v272_v0, %v241_v19  ;;  %v244_v33 = vmax.f32 %v230_v24, 0.0 }
 0x106   :  { %v301_v41 = vmul.f32 %v292_v40, %v245_v35 }
 0x107   :  { %v296_v23 = vmul.f32 %v267_v60, %v240_v20  ;;  %v300_v38 = vmul.f32 %v287_v37, %v244_v33 }
 0x109   :  { %v303_v29 = vadd.f32 %v302_v21, %v296_v23 }
 0x10b   :  { %v304_v32 = vadd.f32 %v303_v29, %v297_v27 }
 0x10d   :  { %v305_v36 = vadd.f32 %v304_v32, %v298_v31 }
 0x10f   :  { %v306_v39 = vadd.f32 %v305_v36, %v299_v34 }
 0x111   :  { %v307_v42 = vadd.f32 %v306_v39, %v300_v38 }
 0x113   :  { %v308_v44 = vadd.f32 %v307_v42, %v301_v41 }
 0x115   :  { %v309_v45 = vrot.slane %v308_v44, 4 }
 0x117   :  { %v310_v47 = vadd.f32 %v309_v45, %v308_v44 }
 0x119   :  { %v311_v48 = vrot.slane %v310_v47, 2 }
 0x11b   :  { %v312_v50 = vadd.f32 %v311_v48, %v310_v47 }
 0x11d   :  { %v313_v52 = vrot.slane %v312_v50, 1 }
 0x11f   :  { %v314_v54 = vadd.f32 %v313_v52, %v312_v50 }
 0x121   :  { %v325_v55 = vadd.f32 %v324_v53, %v314_v54 }
 0x123   :  { %v349_v56 = vmul.f32 -1.442695, %v325_v55 }
 0x125   :  { %387 = vpow2.f32 %v349_v56 }
 0x132   :  { %v388_v57 = vpop.eup %387 }
 0x133   :  { %v329_v58 = vadd.f32 1.0, %v388_v57 }
 0x135   :  { %389 = vrcp.f32 %v329_v58 }
 0x142   :  { %v390_v60 = vpop.eup %389 }
 0x143   :  { %vm333_vm1 = vcmp.lt.f32.partialorder %v332_v59, %v390_v60 }
 0x144   :  { %v350_v62 = vsel %vm333_vm1, 1.0, %v392_v61 }
 0x145   :  { %336 = vst [vmem:[%s529_s6] sm:$0x1] %v350_v62 }

// kernel: adaptive_gcn_forward.4
= control target key start
LH: loop header
LB: loop body
LE: loop exit
PB: predicated region body
PF: predicated region fallthrough
CT: control target
= control target key end

     0   :  { %v1036_v0 = vmov 0   ;;  %vm47_vm0 = vcmask 64512   ;;  %s1356_s2 = inlined_call_operand.vmem [shape: f32[256,1], index: 2, kind: input, shape index: {}]   ;;  %s1357_s1 = inlined_call_operand.vmem [shape: f32[8,128], index: 1, kind: input, shape index: {}]   ;;  %s1358_s0 = inlined_call_operand.vmem [shape: f32[256,8], index: 0, kind: input, shape index: {}]   ;;  %s1359_s3 = inlined_call_operand.vmem [shape: bf16[256,128], index: 3, kind: output, shape index: {}]  }
   0x1   :  { %1035 = vset.pattern.permute.xlu1 %v1036_v0  ;;  %1034 = vset.pattern.permute.xlu0 %v1036_v0  ;;  %v371_v1 = vld [vmem:[%s1356_s2 + $0x10] sm:$0xff]  ;;  %v369_v2 = vld [vmem:[%s1356_s2] sm:$0xff]  ;;  %v15_v6 = vld [vmem:[%s1358_s0 + $0x8] sm:$0xff] }
   0x2   :  { %v46_v3 = vld [vmem:[%s1357_s1] sm:$0xff]  ;;  %413 = vperm.xlu1 %1035, %v371_v1   ;;  %403 = vperm.xlu0 %1034, %v369_v2   ;;  %v31_v7 = vld [vmem:[%s1358_s0 + $0x88] sm:$0xff]  ;;  %v372_v8 = vld [vmem:[%s1356_s2 + $0x18] sm:$0xff] }
   0x3   :  { %v14_v4 = vld [vmem:[%s1358_s0] sm:$0xff]  ;;  %981 = vmatprep.subr.mxu0 %v46_v3  ;;  %1031 = vmatprep.subr.mxu1 %v46_v3  ;;  %v370_v9 = vld [vmem:[%s1356_s2 + $0x8] sm:$0xff]  ;;  %v16_v10 = vld [vmem:[%s1358_s0 + $0x10] sm:$0xff] }
   0x4   :  { %v30_v5 = vld [vmem:[%s1358_s0 + $0x80] sm:$0xff]  ;;  %982 = vmatpush3.msra.mxu0 %v46_v3  ;;  %1032 = vmatpush3.msra.mxu1 %v46_v3  ;;  %v32_v11 = vld [vmem:[%s1358_s0 + $0x90] sm:$0xff]  ;;  %v17_v12 = vld [vmem:[%s1358_s0 + $0x18] sm:$0xff] }
   0x5   :  { %983 = vmatprep.mubr.msk.f32.mxu0 %vm47_vm0, %v14_v4  ;;  %1007 = vmatprep.mubr.msk.f32.mxu1 %vm47_vm0, %v30_v5  ;;  %v33_v13 = vld [vmem:[%s1358_s0 + $0x98] sm:$0xff]  ;;  %v374_v14 = vld [vmem:[%s1356_s2 + $0x28] sm:$0xff]  ;;  %v373_v15 = vld [vmem:[%s1356_s2 + $0x20] sm:$0xff] }
   0x6   :  { %984 = vmatmul.mubr.msk.f32.vlgmr.msra.gmra.mxu0 %vm47_vm0, %v15_v6  ;;  %1008 = vmatmul.mubr.msk.f32.vlgmr.msra.gmra.mxu1 %vm47_vm0, %v31_v7  ;;  %v18_v16 = vld [vmem:[%s1358_s0 + $0x20] sm:$0xff]  ;;  %v19_v18 = vld [vmem:[%s1358_s0 + $0x28] sm:$0xff]  ;;  %v376_v20 = vld [vmem:[%s1356_s2 + $0x38] sm:$0xff] }
   0x7   :  { %418 = vperm.xlu1 %1035, %v372_v8   ;;  %408 = vperm.xlu0 %1034, %v370_v9   ;;  %v34_v17 = vld [vmem:[%s1358_s0 + $0xa0] sm:$0xff]  ;;  %v35_v19 = vld [vmem:[%s1358_s0 + $0xa8] sm:$0xff]  ;;  %v375_v21 = vld [vmem:[%s1356_s2 + $0x30] sm:$0xff] }
   0x8   :  { %986 = vmatprep.mubr.msk.f32.mxu0 %vm47_vm0, %v16_v10  ;;  %1010 = vmatprep.mubr.msk.f32.mxu1 %vm47_vm0, %v32_v11  ;;  %v20_v22 = vld [vmem:[%s1358_s0 + $0x30] sm:$0xff]  ;;  %v21_v24 = vld [vmem:[%s1358_s0 + $0x38] sm:$0xff]  ;;  %v378_v26 = vld [vmem:[%s1356_s2 + $0x48] sm:$0xff] }
   0x9   :  { %v36_v23 = vld [vmem:[%s1358_s0 + $0xb0] sm:$0xff]  ;;  %v37_v25 = vld [vmem:[%s1358_s0 + $0xb8] sm:$0xff]  ;;  %v377_v27 = vld [vmem:[%s1356_s2 + $0x40] sm:$0xff] }
   0xa   :  { %987 = vmatmul.mubr.msk.f32.gmra.mxu0 %vm47_vm0, %v17_v12  ;;  %1011 = vmatmul.mubr.msk.f32.gmra.mxu1 %vm47_vm0, %v33_v13  ;;  %v22_v28 = vld [vmem:[%s1358_s0 + $0x40] sm:$0xff]  ;;  %v23_v30 = vld [vmem:[%s1358_s0 + $0x48] sm:$0xff]  ;;  %v380_v32 = vld [vmem:[%s1356_s2 + $0x58] sm:$0xff] }
   0xb   :  { %428 = vperm.xlu1 %1035, %v374_v14   ;;  %423 = vperm.xlu0 %1034, %v373_v15   ;;  %v38_v29 = vld [vmem:[%s1358_s0 + $0xc0] sm:$0xff]  ;;  %v39_v31 = vld [vmem:[%s1358_s0 + $0xc8] sm:$0xff]  ;;  %v379_v33 = vld [vmem:[%s1356_s2 + $0x50] sm:$0xff] }
   0xc   :  { %989 = vmatprep.mubr.msk.f32.mxu0 %vm47_vm0, %v18_v16  ;;  %1013 = vmatprep.mubr.msk.f32.mxu1 %vm47_vm0, %v34_v17  ;;  %v24_v34 = vld [vmem:[%s1358_s0 + $0x50] sm:$0xff]  ;;  %v25_v36 = vld [vmem:[%s1358_s0 + $0x58] sm:$0xff]  ;;  %v382_v38 = vld [vmem:[%s1356_s2 + $0x68] sm:$0xff] }
   0xd   :  { %v40_v35 = vld [vmem:[%s1358_s0 + $0xd0] sm:$0xff]  ;;  %v41_v37 = vld [vmem:[%s1358_s0 + $0xd8] sm:$0xff]  ;;  %v381_v39 = vld [vmem:[%s1356_s2 + $0x60] sm:$0xff] }
   0xe   :  { %990 = vmatmul.mubr.msk.f32.gmra.mxu0 %vm47_vm0, %v19_v18  ;;  %1014 = vmatmul.mubr.msk.f32.gmra.mxu1 %vm47_vm0, %v35_v19  ;;  %v26_v40 = vld [vmem:[%s1358_s0 + $0x60] sm:$0xff]  ;;  %v27_v42 = vld [vmem:[%s1358_s0 + $0x68] sm:$0xff]  ;;  %v384_v44 = vld [vmem:[%s1356_s2 + $0x78] sm:$0xff] }
   0xf   :  { %438 = vperm.xlu1 %1035, %v376_v20   ;;  %433 = vperm.xlu0 %1034, %v375_v21   ;;  %v42_v41 = vld [vmem:[%s1358_s0 + $0xe0] sm:$0xff]  ;;  %v43_v43 = vld [vmem:[%s1358_s0 + $0xe8] sm:$0xff]  ;;  %v383_v45 = vld [vmem:[%s1356_s2 + $0x70] sm:$0xff] }
  0x10   :  { %992 = vmatprep.mubr.msk.f32.mxu0 %vm47_vm0, %v20_v22  ;;  %1016 = vmatprep.mubr.msk.f32.mxu1 %vm47_vm0, %v36_v23  ;;  %v28_v46 = vld [vmem:[%s1358_s0 + $0x70] sm:$0xff]  ;;  %v29_v48 = vld [vmem:[%s1358_s0 + $0x78] sm:$0xff]  ;;  %v386_v50 = vld [vmem:[%s1356_s2 + $0x88] sm:$0xff] }
  0x11   :  { %v44_v47 = vld [vmem:[%s1358_s0 + $0xf0] sm:$0xff]  ;;  %v45_v49 = vld [vmem:[%s1358_s0 + $0xf8] sm:$0xff]  ;;  %v385_v51 = vld [vmem:[%s1356_s2 + $0x80] sm:$0xff] }
  0x12   :  { %993 = vmatmul.mubr.msk.f32.gmra.mxu0 %vm47_vm0, %v21_v24  ;;  %1017 = vmatmul.mubr.msk.f32.gmra.mxu1 %vm47_vm0, %v37_v25  ;;  %v388_v52 = vld [vmem:[%s1356_s2 + $0x98] sm:$0xff]  ;;  %v387_v53 = vld [vmem:[%s1356_s2 + $0x90] sm:$0xff]  ;;  %v390_v54 = vld [vmem:[%s1356_s2 + $0xa8] sm:$0xff] }
  0x13   :  { %448 = vperm.xlu1 %1035, %v378_v26   ;;  %443 = vperm.xlu0 %1034, %v377_v27   ;;  %v389_v55 = vld [vmem:[%s1356_s2 + $0xa0] sm:$0xff]  ;;  %v392_v56 = vld [vmem:[%s1356_s2 + $0xb8] sm:$0xff]  ;;  %v391_v57 = vld [vmem:[%s1356_s2 + $0xb0] sm:$0xff] }
  0x14   :  { %995 = vmatprep.mubr.msk.f32.mxu0 %vm47_vm0, %v22_v28  ;;  %1019 = vmatprep.mubr.msk.f32.mxu1 %vm47_vm0, %v38_v29  ;;  %v394_v58 = vld [vmem:[%s1356_s2 + $0xc8] sm:$0xff]  ;;  %v393_v59 = vld [vmem:[%s1356_s2 + $0xc0] sm:$0xff]  ;;  %v396_v60 = vld [vmem:[%s1356_s2 + $0xd8] sm:$0xff] }
  0x15   :  { %v395_v61 = vld [vmem:[%s1356_s2 + $0xd0] sm:$0xff]  ;;  %v398_v62 = vld [vmem:[%s1356_s2 + $0xe8] sm:$0xff]  ;;  %v397_v63 = vld [vmem:[%s1356_s2 + $0xe0] sm:$0xff] }
  0x16   :  { %996 = vmatmul.mubr.msk.f32.gmra.mxu0 %vm47_vm0, %v23_v30  ;;  %1020 = vmatmul.mubr.msk.f32.gmra.mxu1 %vm47_vm0, %v39_v31  ;;  %v400_v0 = vld [vmem:[%s1356_s2 + $0xf8] sm:$0xff]  ;;  %v399_v1 = vld [vmem:[%s1356_s2 + $0xf0] sm:$0xff] }
  0x17   :  { %458 = vperm.xlu1 %1035, %v380_v32   ;;  %453 = vperm.xlu0 %1034, %v379_v33  }
  0x18   :  { %998 = vmatprep.mubr.msk.f32.mxu0 %vm47_vm0, %v24_v34  ;;  %1022 = vmatprep.mubr.msk.f32.mxu1 %vm47_vm0, %v40_v35 }
  0x1a   :  { %999 = vmatmul.mubr.msk.f32.gmra.mxu0 %vm47_vm0, %v25_v36  ;;  %1023 = vmatmul.mubr.msk.f32.gmra.mxu1 %vm47_vm0, %v41_v37 }
  0x1b   :  { %468 = vperm.xlu1 %1035, %v382_v38   ;;  %463 = vperm.xlu0 %1034, %v381_v39  }
  0x1c   :  { %1001 = vmatprep.mubr.msk.f32.mxu0 %vm47_vm0, %v26_v40  ;;  %1025 = vmatprep.mubr.msk.f32.mxu1 %vm47_vm0, %v42_v41 }
  0x1e   :  { %1002 = vmatmul.mubr.msk.f32.gmra.mxu0 %vm47_vm0, %v27_v42  ;;  %1026 = vmatmul.mubr.msk.f32.gmra.mxu1 %vm47_vm0, %v43_v43 }
  0x1f   :  { %478 = vperm.xlu1 %1035, %v384_v44   ;;  %473 = vperm.xlu0 %1034, %v383_v45  }
  0x20   :  { %1004 = vmatprep.mubr.msk.f32.mxu0 %vm47_vm0, %v28_v46  ;;  %1028 = vmatprep.mubr.msk.f32.mxu1 %vm47_vm0, %v44_v47 }
  0x22   :  { %1005 = vmatmul.mubr.msk.f32.gmra.mxu0 %vm47_vm0, %v29_v48  ;;  %1029 = vmatmul.mubr.msk.f32.gmra.mxu1 %vm47_vm0, %v45_v49 }
  0x23   :  { %488 = vperm.xlu1 %1035, %v386_v50   ;;  %483 = vperm.xlu0 %1034, %v385_v51  }
  0x27   :  { %498 = vperm.xlu1 %1035, %v388_v52   ;;  %493 = vperm.xlu0 %1034, %v387_v53  }
  0x2b   :  { %508 = vperm.xlu1 %1035, %v390_v54   ;;  %503 = vperm.xlu0 %1034, %v389_v55  }
  0x2f   :  { %518 = vperm.xlu1 %1035, %v392_v56   ;;  %513 = vperm.xlu0 %1034, %v391_v57  }
  0x33   :  { %528 = vperm.xlu1 %1035, %v394_v58   ;;  %523 = vperm.xlu0 %1034, %v393_v59  }
  0x37   :  { %538 = vperm.xlu1 %1035, %v396_v60   ;;  %533 = vperm.xlu0 %1034, %v395_v61  }
  0x3b   :  { %548 = vperm.xlu1 %1035, %v398_v62   ;;  %543 = vperm.xlu0 %1034, %v397_v63  }
  0x3f   :  { %558 = vperm.xlu1 %1035, %v400_v0   ;;  %553 = vperm.xlu0 %1034, %v399_v1  }
  0x7d   :  { %v414_v2 = vpop.permute.xlu1 %413  ;;  %v404_v3 = vpop.permute.xlu0 %403 }
  0x82   :  { %v419_v4 = vpop.permute.xlu1 %418  ;;  %v409_v5 = vpop.permute.xlu0 %408 }
  0x86   :  { %v429_v6 = vpop.permute.xlu1 %428  ;;  %v424_v7 = vpop.permute.xlu0 %423 }
  0x8a   :  { %v439_v8 = vpop.permute.xlu1 %438  ;;  %v434_v9 = vpop.permute.xlu0 %433 }
  0x8e   :  { %v1284_v10 = vpop.permute.xlu1 %448  ;;  %v1286_v11 = vpop.permute.xlu0 %443 }
  0x92   :  { %v1288_v12 = vpop.permute.xlu1 %458  ;;  %v1290_v13 = vpop.permute.xlu0 %453 }
  0x96   :  { %v1292_v14 = vpop.permute.xlu1 %468  ;;  %v1294_v15 = vpop.permute.xlu0 %463 }
  0x9a   :  { %v1296_v16 = vpop.permute.xlu1 %478  ;;  %v1298_v17 = vpop.permute.xlu0 %473 }
  0x9e   :  { %v489_v18 = vpop.permute.xlu1 %488  ;;  %v484_v19 = vpop.permute.xlu0 %483 }
  0xa2   :  { %v499_v20 = vpop.permute.xlu1 %498  ;;  %v494_v21 = vpop.permute.xlu0 %493 }
  0xa6   :  { %v509_v22 = vpop.permute.xlu1 %508  ;;  %v504_v23 = vpop.permute.xlu0 %503 }
  0xaa   :  { %v519_v34 = vpop.permute.xlu1 %518  ;;  %v514_v35 = vpop.permute.xlu0 %513 }
  0xae   :  { %v529_v50 = vpop.permute.xlu1 %528  ;;  %v524_v51 = vpop.permute.xlu0 %523 }
  0xc6   :  { %v985_v24 = vpop.f32.mrf.mxu0  ;;  %v1009_v25 = vpop.f32.mrf.mxu1 }
  0xc7   :  { %v562_v28 = vmul.f32 %v985_v24, %v409_v5  ;;  %v578_v29 = vmul.f32 %v1009_v25, %v489_v18  ;;  %v534_v5 = vpop.permute.xlu0 %533 }
  0xc8   :  { %v210_v26 = vpop.f32.mrf.mxu0  ;;  %v290_v27 = vpop.f32.mrf.mxu1 }
  0xc9   :  { %v561_v30 = vmul.f32 %v404_v3, %v210_v26  ;;  %v577_v31 = vmul.f32 %v484_v19, %v290_v27 }
  0xca   :  { %v988_v32 = vpop.f32.mrf.mxu0  ;;  %v1012_v33 = vpop.f32.mrf.mxu1 }
  0xcb   :  { %v856_v36 = vpack.c.bf16 %v562_v28, %v561_v30  ;;  %v896_v37 = vpack.c.bf16 %v578_v29, %v577_v31  ;;  %v564_v40 = vmul.f32 %v988_v32, %v419_v4  ;;  %v580_v41 = vmul.f32 %v1012_v33, %v499_v20  ;;  %v539_v4 = vpop.permute.xlu1 %538  ;;  %v544_v29 = vpop.permute.xlu0 %543 }
  0xcc   :  { %v220_v38 = vpop.f32.mrf.mxu0  ;;  %v300_v39 = vpop.f32.mrf.mxu1 }
  0xcd   :  { %857 = vst [vmem:[%s1359_s3] sm:$0xff] %v856_v36   ;;  %940 = vst [vmem:[%s1359_s3 + $0x40] sm:$0xff] %v896_v37   ;;  %v563_v42 = vmul.f32 %v414_v2, %v220_v38  ;;  %v579_v43 = vmul.f32 %v494_v21, %v300_v39 }
  0xce   :  { %v991_v44 = vpop.f32.mrf.mxu0  ;;  %v1015_v45 = vpop.f32.mrf.mxu1 }
  0xcf   :  { %v861_v46 = vpack.c.bf16 %v564_v40, %v563_v42  ;;  %v901_v47 = vpack.c.bf16 %v580_v41, %v579_v43  ;;  %v566_v52 = vmul.f32 %v991_v44, %v429_v6  ;;  %v582_v53 = vmul.f32 %v1015_v45, %v509_v22  ;;  %v549_v28 = vpop.permute.xlu1 %548  ;;  %v554_v43 = vpop.permute.xlu0 %553 }
  0xd0   :  { %v230_v48 = vpop.f32.mrf.mxu0  ;;  %v310_v49 = vpop.f32.mrf.mxu1 }
  0xd1   :  { %933 = vst [vmem:[%s1359_s3 + $0x8] sm:$0xff] %v861_v46   ;;  %941 = vst [vmem:[%s1359_s3 + $0x48] sm:$0xff] %v901_v47   ;;  %v565_v54 = vmul.f32 %v424_v7, %v230_v48  ;;  %v581_v55 = vmul.f32 %v504_v23, %v310_v49 }
  0xd2   :  { %v994_v56 = vpop.f32.mrf.mxu0  ;;  %v1018_v57 = vpop.f32.mrf.mxu1 }
  0xd3   :  { %v866_v58 = vpack.c.bf16 %v566_v52, %v565_v54  ;;  %v906_v59 = vpack.c.bf16 %v582_v53, %v581_v55  ;;  %v568_v62 = vmul.f32 %v994_v56, %v439_v8  ;;  %v584_v63 = vmul.f32 %v1018_v57, %v519_v34  ;;  %v559_v42 = vpop.permute.xlu1 %558 }
  0xd4   :  { %v240_v60 = vpop.f32.mrf.mxu0  ;;  %v320_v61 = vpop.f32.mrf.mxu1 }
  0xd5   :  { %934 = vst [vmem:[%s1359_s3 + $0x10] sm:$0xff] %v866_v58   ;;  %942 = vst [vmem:[%s1359_s3 + $0x50] sm:$0xff] %v906_v59   ;;  %v567_v0 = vmul.f32 %v434_v9, %v240_v60  ;;  %v583_v1 = vmul.f32 %v514_v35, %v320_v61 }
  0xd6   :  { %v997_v2 = vpop.f32.mrf.mxu0  ;;  %v1021_v3 = vpop.f32.mrf.mxu1 }
  0xd7   :  { %v871_v6 = vpack.c.bf16 %v568_v62, %v567_v0  ;;  %v911_v7 = vpack.c.bf16 %v584_v63, %v583_v1  ;;  %v570_v8 = vmul.f32 %v997_v2, %v1284_v10  ;;  %v586_v9 = vmul.f32 %v1021_v3, %v529_v50 }
  0xd8   :  { %v250_v18 = vpop.f32.mrf.mxu0  ;;  %v330_v19 = vpop.f32.mrf.mxu1 }
  0xd9   :  { %935 = vst [vmem:[%s1359_s3 + $0x18] sm:$0xff] %v871_v6   ;;  %943 = vst [vmem:[%s1359_s3 + $0x58] sm:$0xff] %v911_v7   ;;  %v569_v20 = vmul.f32 %v1286_v11, %v250_v18  ;;  %v585_v21 = vmul.f32 %v524_v51, %v330_v19 }
  0xda   :  { %v1000_v22 = vpop.f32.mrf.mxu0  ;;  %v1024_v23 = vpop.f32.mrf.mxu1 }
  0xdb   :  { %v876_v24 = vpack.c.bf16 %v570_v8, %v569_v20  ;;  %v916_v25 = vpack.c.bf16 %v586_v9, %v585_v21  ;;  %v572_v10 = vmul.f32 %v1000_v22, %v1288_v12  ;;  %v588_v11 = vmul.f32 %v1024_v23, %v539_v4 }
  0xdc   :  { %v260_v26 = vpop.f32.mrf.mxu0  ;;  %v340_v27 = vpop.f32.mrf.mxu1 }
  0xdd   :  { %936 = vst [vmem:[%s1359_s3 + $0x20] sm:$0xff] %v876_v24   ;;  %944 = vst [vmem:[%s1359_s3 + $0x60] sm:$0xff] %v916_v25   ;;  %v571_v30 = vmul.f32 %v1290_v13, %v260_v26  ;;  %v587_v31 = vmul.f32 %v534_v5, %v340_v27 }
  0xde   :  { %v1003_v32 = vpop.f32.mrf.mxu0  ;;  %v1027_v33 = vpop.f32.mrf.mxu1 }
  0xdf   :  { %v881_v34 = vpack.c.bf16 %v572_v10, %v571_v30  ;;  %v921_v35 = vpack.c.bf16 %v588_v11, %v587_v31  ;;  %v574_v12 = vmul.f32 %v1003_v32, %v1292_v14  ;;  %v590_v38 = vmul.f32 %v1027_v33, %v549_v28 }
  0xe0   :  { %v270_v36 = vpop.f32.mrf.mxu0  ;;  %v350_v37 = vpop.f32.mrf.mxu1 }
  0xe1   :  { %937 = vst [vmem:[%s1359_s3 + $0x28] sm:$0xff] %v881_v34   ;;  %945 = vst [vmem:[%s1359_s3 + $0x68] sm:$0xff] %v921_v35   ;;  %v573_v13 = vmul.f32 %v1294_v15, %v270_v36  ;;  %v589_v39 = vmul.f32 %v544_v29, %v350_v37 }
  0xe2   :  { %v1006_v40 = vpop.f32.mrf.mxu0  ;;  %v1030_v41 = vpop.f32.mrf.mxu1 }
  0xe3   :  { %v886_v44 = vpack.c.bf16 %v574_v12, %v573_v13  ;;  %v926_v45 = vpack.c.bf16 %v590_v38, %v589_v39  ;;  %v576_v14 = vmul.f32 %v1006_v40, %v1296_v16  ;;  %v592_v15 = vmul.f32 %v1030_v41, %v559_v42 }
  0xe4   :  { %v280_v46 = vpop.f32.mrf.mxu0  ;;  %v360_v47 = vpop.f32.mrf.mxu1 }
  0xe5   :  { %938 = vst [vmem:[%s1359_s3 + $0x30] sm:$0xff] %v886_v44   ;;  %946 = vst [vmem:[%s1359_s3 + $0x70] sm:$0xff] %v926_v45   ;;  %v575_v48 = vmul.f32 %v1298_v17, %v280_v46  ;;  %v591_v49 = vmul.f32 %v554_v43, %v360_v47 }
  0xe7   :  { %v891_v50 = vpack.c.bf16 %v576_v14, %v575_v48  ;;  %v931_v51 = vpack.c.bf16 %v592_v15, %v591_v49 }
  0xe9   :  { %939 = vst [vmem:[%s1359_s3 + $0x38] sm:$0xff] %v891_v50   ;;  %947 = vst [vmem:[%s1359_s3 + $0x78] sm:$0xff] %v931_v51  }

// kernel: adaptive_gcn_forward.5
= control target key start
LH: loop header
LB: loop body
LE: loop exit
PB: predicated region body
PF: predicated region fallthrough
CT: control target
= control target key end

     0   :  { %v1042_v1 = vmov 0   ;;  %s1480_s1 = inlined_call_operand.vmem [shape: bf16[256,128], index: 1, kind: input, shape index: {}]   ;;  %s1481_s0 = inlined_call_operand.vmem [shape: bf16[256,256], index: 0, kind: input, shape index: {}]   ;;  %s1482_s2 = inlined_call_operand.vmem [shape: f32[256,1], index: 2, kind: input, shape index: {}]   ;;  %s1483_s3 = inlined_call_operand.vmem [shape: f32[1,128], index: 3, kind: input, shape index: {}]   ;;  %s1484_s4 = inlined_call_operand.vmem [shape: f32[256,128], index: 4, kind: output, shape index: {}]  }
   0x1   :  { %v978_v0 = vld [vmem:[%s1480_s1 + $0x78] sm:$0xff]   ;;  %977 = vset.pattern.permute.xlu1 %v1042_v1  ;;  %976 = vset.pattern.permute.xlu0 %v1042_v1  ;;  %v980_v3 = vld [vmem:[%s1480_s1 + $0x70] sm:$0xff]   ;;  %v982_v5 = vld [vmem:[%s1480_s1 + $0x68] sm:$0xff]  }
   0x2   :  { %v979_v2 = vld [vmem:[%s1480_s1 + $0x38] sm:$0xff]   ;;  %847 = vmatprep.subr.bf16.mxu0 %v978_v0  ;;  %959 = vmatprep.subr.bf16.mxu1 %v978_v0  ;;  %v981_v4 = vld [vmem:[%s1480_s1 + $0x30] sm:$0xff]   ;;  %v983_v6 = vld [vmem:[%s1480_s1 + $0x28] sm:$0xff]  }
   0x3   :  { %848 = vmatpush3.bf16.msra.mxu0 %v979_v2  ;;  %967 = vmatpush3.bf16.msra.mxu1 %v979_v2  ;;  %v984_v7 = vld [vmem:[%s1480_s1 + $0x60] sm:$0xff]   ;;  %v986_v9 = vld [vmem:[%s1480_s1 + $0x58] sm:$0xff]   ;;  %v988_v11 = vld [vmem:[%s1480_s1 + $0x50] sm:$0xff]  }
   0x4   :  { %849 = vmatprep.subr.bf16.mxu0 %v980_v3  ;;  %960 = vmatprep.subr.bf16.mxu1 %v980_v3  ;;  %v985_v8 = vld [vmem:[%s1480_s1 + $0x20] sm:$0xff]   ;;  %v987_v10 = vld [vmem:[%s1480_s1 + $0x18] sm:$0xff]   ;;  %v989_v14 = vld [vmem:[%s1480_s1 + $0x10] sm:$0xff]  }
   0x5   :  { %v996_v12 = vld [vmem:[%s1481_s0 + $0x4] ss:$8 sps:$4 sm:$0xff]   ;;  %v501_v16 = vld [vmem:[%s1482_s2 + $0x10] sm:$0xff]  ;;  %v502_v20 = vld [vmem:[%s1482_s2 + $0x18] sm:$0xff] }
   0x6   :  { %v999_v13 = vld [vmem:[%s1481_s0 + $0x84] ss:$8 sps:$4 sm:$0xff]   ;;  %370 = vmatprep.mubr.bf16.mxu0 %v996_v12  ;;  %543 = vperm.xlu1 %977, %v501_v16   ;;  %v994_v25 = vld [vmem:[%s1481_s0] ss:$8 sps:$4 sm:$0xff]   ;;  %v1000_v27 = vld [vmem:[%s1481_s0 + $0x14] ss:$8 sps:$4 sm:$0xff]  }
   0x7   :  { %850 = vmatpush3.bf16.msra.mxu0 %v981_v4  ;;  %968 = vmatpush3.bf16.msra.mxu1 %v981_v4  ;;  %v990_v15 = vld [vmem:[%s1480_s1 + $0x48] sm:$0xff]   ;;  %v499_v17 = vld [vmem:[%s1482_s2] sm:$0xff]  ;;  %v1002_v28 = vld [vmem:[%s1481_s0 + $0x94] ss:$8 sps:$4 sm:$0xff]  }
   0x8   :  { %851 = vmatprep.subr.bf16.mxu0 %v982_v5  ;;  %961 = vmatprep.subr.bf16.mxu1 %v982_v5  ;;  %v991_v18 = vld [vmem:[%s1480_s1 + $0x8] sm:$0xff]   ;;  %v992_v19 = vld [vmem:[%s1480_s1 + $0x40] sm:$0xff]   ;;  %v506_v29 = vld [vmem:[%s1482_s2 + $0x38] sm:$0xff] }
   0x9   :  { %434 = vmatprep.mubr.bf16.mxu1 %v999_v13  ;;  %533 = vperm.xlu0 %976, %v499_v17   ;;  %v993_v21 = vld [vmem:[%s1480_s1] sm:$0xff]   ;;  %v500_v22 = vld [vmem:[%s1482_s2 + $0x8] sm:$0xff]  ;;  %v505_v30 = vld [vmem:[%s1482_s2 + $0x30] sm:$0xff] }
   0xa   :  { %548 = vperm.xlu1 %977, %v502_v20   ;;  %v504_v23 = vld [vmem:[%s1482_s2 + $0x28] sm:$0xff]  ;;  %v503_v24 = vld [vmem:[%s1482_s2 + $0x20] sm:$0xff]  ;;  %v1004_v31 = vld [vmem:[%s1481_s0 + $0x10] ss:$8 sps:$4 sm:$0xff]  }
   0xb   :  { %852 = vmatpush3.bf16.msra.mxu0 %v983_v6  ;;  %969 = vmatpush3.bf16.msra.mxu1 %v983_v6  ;;  %v997_v26 = vld [vmem:[%s1481_s0 + $0x80] ss:$8 sps:$4 sm:$0xff]   ;;  %v1005_v32 = vld [vmem:[%s1481_s0 + $0x90] ss:$8 sps:$4 sm:$0xff]   ;;  %v1006_v35 = vld [vmem:[%s1481_s0 + $0x24] ss:$8 sps:$4 sm:$0xff]  }
   0xc   :  { %853 = vmatprep.subr.bf16.mxu0 %v984_v7  ;;  %962 = vmatprep.subr.bf16.mxu1 %v984_v7  ;;  %v508_v33 = vld [vmem:[%s1482_s2 + $0x48] sm:$0xff]  ;;  %v507_v34 = vld [vmem:[%s1482_s2 + $0x40] sm:$0xff]  ;;  %v510_v37 = vld [vmem:[%s1482_s2 + $0x58] sm:$0xff] }
   0xd   :  { %538 = vperm.xlu0 %976, %v500_v22   ;;  %v1008_v36 = vld [vmem:[%s1481_s0 + $0xa4] ss:$8 sps:$4 sm:$0xff]   ;;  %v509_v38 = vld [vmem:[%s1482_s2 + $0x50] sm:$0xff]  ;;  %v1010_v41 = vld [vmem:[%s1481_s0 + $0x20] ss:$8 sps:$4 sm:$0xff]  }
   0xe   :  { %558 = vperm.xlu1 %977, %v504_v23   ;;  %v512_v39 = vld [vmem:[%s1482_s2 + $0x68] sm:$0xff]  ;;  %v511_v40 = vld [vmem:[%s1482_s2 + $0x60] sm:$0xff]  ;;  %v1012_v43 = vld [vmem:[%s1481_s0 + $0x34] ss:$8 sps:$4 sm:$0xff]  }
   0xf   :  { %854 = vmatpush3.bf16.msra.mxu0 %v985_v8  ;;  %970 = vmatpush3.bf16.msra.mxu1 %v985_v8  ;;  %v1011_v42 = vld [vmem:[%s1481_s0 + $0xa0] ss:$8 sps:$4 sm:$0xff]   ;;  %v1014_v44 = vld [vmem:[%s1481_s0 + $0xb4] ss:$8 sps:$4 sm:$0xff]   ;;  %v1016_v49 = vld [vmem:[%s1481_s0 + $0x30] ss:$8 sps:$4 sm:$0xff]  }
  0x10   :  { %855 = vmatprep.subr.bf16.mxu0 %v986_v9  ;;  %963 = vmatprep.subr.bf16.mxu1 %v986_v9  ;;  %v514_v45 = vld [vmem:[%s1482_s2 + $0x78] sm:$0xff]  ;;  %v513_v46 = vld [vmem:[%s1482_s2 + $0x70] sm:$0xff]  ;;  %v516_v47 = vld [vmem:[%s1482_s2 + $0x88] sm:$0xff] }
  0x11   :  { %553 = vperm.xlu0 %976, %v503_v24   ;;  %v515_v48 = vld [vmem:[%s1482_s2 + $0x80] sm:$0xff]  ;;  %v1017_v50 = vld [vmem:[%s1481_s0 + $0xb0] ss:$8 sps:$4 sm:$0xff]   ;;  %v520_v55 = vld [vmem:[%s1482_s2 + $0xa8] sm:$0xff] }
  0x12   :  { %568 = vperm.xlu1 %977, %v506_v29   ;;  %v1018_v51 = vld [vmem:[%s1481_s0 + $0x44] ss:$8 sps:$4 sm:$0xff]   ;;  %v518_v53 = vld [vmem:[%s1482_s2 + $0x98] sm:$0xff]  ;;  %v517_v54 = vld [vmem:[%s1482_s2 + $0x90] sm:$0xff] }
  0x13   :  { %856 = vmatpush3.bf16.msra.mxu0 %v987_v10  ;;  %971 = vmatpush3.bf16.msra.mxu1 %v987_v10  ;;  %v1020_v52 = vld [vmem:[%s1481_s0 + $0xc4] ss:$8 sps:$4 sm:$0xff]   ;;  %v1022_v57 = vld [vmem:[%s1481_s0 + $0x40] ss:$8 sps:$4 sm:$0xff]   ;;  %v1024_v59 = vld [vmem:[%s1481_s0 + $0x54] ss:$8 sps:$4 sm:$0xff]  }
  0x14   :  { %857 = vmatprep.subr.bf16.mxu0 %v988_v11  ;;  %964 = vmatprep.subr.bf16.mxu1 %v988_v11  ;;  %v519_v56 = vld [vmem:[%s1482_s2 + $0xa0] sm:$0xff]  ;;  %v1026_v60 = vld [vmem:[%s1481_s0 + $0xd4] ss:$8 sps:$4 sm:$0xff]   ;;  %v524_v63 = vld [vmem:[%s1482_s2 + $0xc8] sm:$0xff] }
  0x15   :  { %563 = vperm.xlu0 %976, %v505_v30   ;;  %v1023_v58 = vld [vmem:[%s1481_s0 + $0xc0] ss:$8 sps:$4 sm:$0xff]   ;;  %v522_v61 = vld [vmem:[%s1482_s2 + $0xb8] sm:$0xff]  ;;  %v521_v62 = vld [vmem:[%s1482_s2 + $0xb0] sm:$0xff] }
  0x16   :  { %578 = vperm.xlu1 %977, %v508_v33   ;;  %v523_v0 = vld [vmem:[%s1482_s2 + $0xc0] sm:$0xff]  ;;  %v1028_v1 = vld [vmem:[%s1481_s0 + $0x50] ss:$8 sps:$4 sm:$0xff]   ;;  %v528_v7 = vld [vmem:[%s1482_s2 + $0xe8] sm:$0xff] }
  0x17   :  { %858 = vmatpush3.bf16.msra.mxu0 %v989_v14  ;;  %972 = vmatpush3.bf16.msra.mxu1 %v989_v14  ;;  %v1029_v2 = vld [vmem:[%s1481_s0 + $0xd0] ss:$8 sps:$4 sm:$0xff]   ;;  %v1030_v3 = vld [vmem:[%s1481_s0 + $0x64] ss:$8 sps:$4 sm:$0xff]   ;;  %v1034_v9 = vld [vmem:[%s1481_s0 + $0x60] ss:$8 sps:$4 sm:$0xff]  }
  0x18   :  { %859 = vmatprep.subr.bf16.mxu0 %v990_v15  ;;  %965 = vmatprep.subr.bf16.mxu1 %v990_v15  ;;  %v1032_v4 = vld [vmem:[%s1481_s0 + $0xe4] ss:$8 sps:$4 sm:$0xff]   ;;  %v526_v5 = vld [vmem:[%s1482_s2 + $0xd8] sm:$0xff]  ;;  %v525_v6 = vld [vmem:[%s1482_s2 + $0xd0] sm:$0xff] }
  0x19   :  { %573 = vperm.xlu0 %976, %v507_v34   ;;  %v527_v8 = vld [vmem:[%s1482_s2 + $0xe0] sm:$0xff]  ;;  %v1036_v11 = vld [vmem:[%s1481_s0 + $0x74] ss:$8 sps:$4 sm:$0xff]   ;;  %v1040_v15 = vld [vmem:[%s1481_s0 + $0x70] ss:$8 sps:$4 sm:$0xff]  }
  0x1a   :  { %588 = vperm.xlu1 %977, %v510_v37   ;;  %v1035_v10 = vld [vmem:[%s1481_s0 + $0xe0] ss:$8 sps:$4 sm:$0xff]   ;;  %v1038_v12 = vld [vmem:[%s1481_s0 + $0xf4] ss:$8 sps:$4 sm:$0xff]   ;;  %v1041_v16 = vld [vmem:[%s1481_s0 + $0xf0] ss:$8 sps:$4 sm:$0xff]  }
  0x1b   :  { %860 = vmatpush3.bf16.msra.mxu0 %v991_v18  ;;  %973 = vmatpush3.bf16.msra.mxu1 %v991_v18  ;;  %v530_v13 = vld [vmem:[%s1482_s2 + $0xf8] sm:$0xff]  ;;  %v529_v14 = vld [vmem:[%s1482_s2 + $0xf0] sm:$0xff] }
  0x1c   :  { %861 = vmatprep.subr.bf16.mxu0 %v992_v19  ;;  %966 = vmatprep.subr.bf16.mxu1 %v992_v19 }
  0x1d   :  { %583 = vperm.xlu0 %976, %v509_v38  }
  0x1e   :  { %598 = vperm.xlu1 %977, %v512_v39  }
  0x1f   :  { %862 = vmatpush3.bf16.msra.mxu0 %v993_v21  ;;  %974 = vmatpush3.bf16.msra.mxu1 %v993_v21 }
  0x21   :  { %593 = vperm.xlu0 %976, %v511_v40   ;;  %v1337_v40 = vld [vmem:[%s1483_s3] ss:$0 sm:$0xff] }
  0x22   :  { %371 = vmatmul.mubr.bf16.vlgmr.msra.gmra.mxu0 %v994_v25  ;;  %435 = vmatmul.mubr.bf16.vlgmr.msra.gmra.mxu1 %v997_v26 }
  0x23   :  { %378 = vmatprep.mubr.bf16.mxu0 %v1000_v27  ;;  %442 = vmatprep.mubr.bf16.mxu1 %v1002_v28 }
  0x24   :  { %608 = vperm.xlu1 %977, %v514_v45  }
  0x25   :  { %603 = vperm.xlu0 %976, %v513_v46  }
  0x28   :  { %618 = vperm.xlu1 %977, %v516_v47  }
  0x29   :  { %613 = vperm.xlu0 %976, %v515_v48  }
  0x2a   :  { %379 = vmatmul.mubr.bf16.gmra.mxu0 %v1004_v31  ;;  %443 = vmatmul.mubr.bf16.gmra.mxu1 %v1005_v32 }
  0x2b   :  { %386 = vmatprep.mubr.bf16.mxu0 %v1006_v35  ;;  %450 = vmatprep.mubr.bf16.mxu1 %v1008_v36 }
  0x2c   :  { %628 = vperm.xlu1 %977, %v518_v53  }
  0x2d   :  { %623 = vperm.xlu0 %976, %v517_v54  }
  0x30   :  { %638 = vperm.xlu1 %977, %v520_v55  }
  0x31   :  { %633 = vperm.xlu0 %976, %v519_v56  }
  0x32   :  { %387 = vmatmul.mubr.bf16.gmra.mxu0 %v1010_v41  ;;  %451 = vmatmul.mubr.bf16.gmra.mxu1 %v1011_v42 }
  0x33   :  { %394 = vmatprep.mubr.bf16.mxu0 %v1012_v43  ;;  %458 = vmatprep.mubr.bf16.mxu1 %v1014_v44 }
  0x34   :  { %648 = vperm.xlu1 %977, %v522_v61  }
  0x35   :  { %643 = vperm.xlu0 %976, %v521_v62  }
  0x38   :  { %658 = vperm.xlu1 %977, %v524_v63  }
  0x39   :  { %653 = vperm.xlu0 %976, %v523_v0  }
  0x3a   :  { %395 = vmatmul.mubr.bf16.gmra.mxu0 %v1016_v49  ;;  %459 = vmatmul.mubr.bf16.gmra.mxu1 %v1017_v50 }
  0x3b   :  { %402 = vmatprep.mubr.bf16.mxu0 %v1018_v51  ;;  %466 = vmatprep.mubr.bf16.mxu1 %v1020_v52 }
  0x3c   :  { %668 = vperm.xlu1 %977, %v526_v5  }
  0x3d   :  { %663 = vperm.xlu0 %976, %v525_v6  }
  0x40   :  { %678 = vperm.xlu1 %977, %v528_v7  }
  0x41   :  { %673 = vperm.xlu0 %976, %v527_v8  }
  0x42   :  { %403 = vmatmul.mubr.bf16.gmra.mxu0 %v1022_v57  ;;  %467 = vmatmul.mubr.bf16.gmra.mxu1 %v1023_v58 }
  0x43   :  { %410 = vmatprep.mubr.bf16.mxu0 %v1024_v59  ;;  %474 = vmatprep.mubr.bf16.mxu1 %v1026_v60 }
  0x44   :  { %688 = vperm.xlu1 %977, %v530_v13  }
  0x45   :  { %683 = vperm.xlu0 %976, %v529_v14  }
  0x4a   :  { %411 = vmatmul.mubr.bf16.gmra.mxu0 %v1028_v1  ;;  %475 = vmatmul.mubr.bf16.gmra.mxu1 %v1029_v2 }
  0x4b   :  { %418 = vmatprep.mubr.bf16.mxu0 %v1030_v3  ;;  %482 = vmatprep.mubr.bf16.mxu1 %v1032_v4 }
  0x52   :  { %419 = vmatmul.mubr.bf16.gmra.mxu0 %v1034_v9  ;;  %483 = vmatmul.mubr.bf16.gmra.mxu1 %v1035_v10 }
  0x53   :  { %426 = vmatprep.mubr.bf16.mxu0 %v1036_v11  ;;  %490 = vmatprep.mubr.bf16.mxu1 %v1038_v12 }
  0x5a   :  { %427 = vmatmul.mubr.bf16.gmra.mxu0 %v1040_v15  ;;  %491 = vmatmul.mubr.bf16.gmra.mxu1 %v1041_v16 }
  0x81   :  { %v544_v18 = vpop.permute.xlu1 %543 }
  0x84   :  { %v534_v17 = vpop.permute.xlu0 %533 }
  0x85   :  { %v1308_v20 = vpop.permute.xlu1 %548 }
  0x88   :  { %v539_v19 = vpop.permute.xlu0 %538 }
  0x89   :  { %v1312_v22 = vpop.permute.xlu1 %558 }
  0x8c   :  { %v1310_v21 = vpop.permute.xlu0 %553 }
  0x8d   :  { %v1316_v24 = vpop.permute.xlu1 %568 }
  0x90   :  { %v1314_v23 = vpop.permute.xlu0 %563 }
  0x91   :  { %v1320_v26 = vpop.permute.xlu1 %578 }
  0x94   :  { %v1318_v25 = vpop.permute.xlu0 %573 }
  0x95   :  { %v1324_v28 = vpop.permute.xlu1 %588 }
  0x98   :  { %v1322_v27 = vpop.permute.xlu0 %583 }
  0x99   :  { %v1328_v30 = vpop.permute.xlu1 %598 }
  0x9c   :  { %v1326_v29 = vpop.permute.xlu0 %593 }
  0x9f   :  { %v1332_v34 = vpop.permute.xlu1 %608 }
  0xa0   :  { %v1330_v31 = vpop.permute.xlu0 %603 }
  0xa3   :  { %v619_v47 = vpop.permute.xlu1 %618 }
  0xa4   :  { %v614_v37 = vpop.permute.xlu0 %613 }
  0xa7   :  { %v629_v5 = vpop.permute.xlu1 %628 }
  0xa8   :  { %v624_v58 = vpop.permute.xlu0 %623 }
  0xac   :  { %v634_v16 = vpop.permute.xlu0 %633 }
  0xe2   :  { %v863_v32 = vpop.f32.mrf.mxu0  ;;  %v911_v33 = vpop.f32.mrf.mxu1 }
  0xe4   :  { %v864_v35 = vpop.f32.mrf.mxu0  ;;  %v912_v36 = vpop.f32.mrf.mxu1 }
  0xe5   :  { %v865_v38 = vadd.f32 %v864_v35, %v863_v32  ;;  %v913_v39 = vadd.f32 %v912_v36, %v911_v33 }
  0xe6   :  { %v866_v41 = vpop.f32.mrf.mxu0  ;;  %v914_v42 = vpop.f32.mrf.mxu1 }
  0xe7   :  { %v691_v43 = vmul.f32 %v865_v38, %v534_v17  ;;  %v707_v44 = vmul.f32 %v913_v39, %v614_v37  ;;  %v639_v39 = vpop.permute.xlu1 %638 }
  0xe8   :  { %v867_v45 = vpop.f32.mrf.mxu0  ;;  %v915_v46 = vpop.f32.mrf.mxu1 }
  0xe9   :  { %v730_v48 = vadd.f32 %v1337_v40, %v691_v43  ;;  %v746_v49 = vadd.f32 %v1337_v40, %v707_v44  ;;  %v868_v50 = vadd.f32 %v867_v45, %v866_v41  ;;  %v916_v51 = vadd.f32 %v915_v46, %v914_v42 }
  0xea   :  { %v869_v52 = vpop.f32.mrf.mxu0  ;;  %v917_v53 = vpop.f32.mrf.mxu1 }
  0xeb   :  { %762 = vst [vmem:[%s1484_s4] sm:$0xff] %v730_v48  ;;  %778 = vst [vmem:[%s1484_s4 + $0x80] sm:$0xff] %v746_v49  ;;  %v692_v54 = vmul.f32 %v868_v50, %v539_v19  ;;  %v708_v55 = vmul.f32 %v916_v51, %v619_v47  ;;  %v644_v50 = vpop.permute.xlu0 %643 }
  0xec   :  { %v870_v56 = vpop.f32.mrf.mxu0  ;;  %v918_v57 = vpop.f32.mrf.mxu1 }
  0xed   :  { %v731_v59 = vadd.f32 %v1337_v40, %v692_v54  ;;  %v747_v60 = vadd.f32 %v1337_v40, %v708_v55  ;;  %v871_v61 = vadd.f32 %v870_v56, %v869_v52  ;;  %v919_v62 = vadd.f32 %v918_v57, %v917_v53 }
  0xee   :  { %v872_v63 = vpop.f32.mrf.mxu0  ;;  %v920_v0 = vpop.f32.mrf.mxu1 }
  0xef   :  { %763 = vst [vmem:[%s1484_s4 + $0x8] sm:$0xff] %v731_v59  ;;  %779 = vst [vmem:[%s1484_s4 + $0x88] sm:$0xff] %v747_v60  ;;  %v693_v1 = vmul.f32 %v871_v61, %v544_v18  ;;  %v709_v2 = vmul.f32 %v919_v62, %v624_v58  ;;  %v649_v60 = vpop.permute.xlu1 %648 }
  0xf0   :  { %v873_v3 = vpop.f32.mrf.mxu0  ;;  %v921_v4 = vpop.f32.mrf.mxu1 }
  0xf1   :  { %v732_v6 = vadd.f32 %v1337_v40, %v693_v1  ;;  %v748_v7 = vadd.f32 %v1337_v40, %v709_v2  ;;  %v874_v8 = vadd.f32 %v873_v3, %v872_v63  ;;  %v922_v9 = vadd.f32 %v921_v4, %v920_v0 }
  0xf2   :  { %v875_v10 = vpop.f32.mrf.mxu0  ;;  %v923_v11 = vpop.f32.mrf.mxu1 }
  0xf3   :  { %764 = vst [vmem:[%s1484_s4 + $0x10] sm:$0xff] %v732_v6  ;;  %780 = vst [vmem:[%s1484_s4 + $0x90] sm:$0xff] %v748_v7  ;;  %v694_v12 = vmul.f32 %v874_v8, %v1308_v20  ;;  %v710_v13 = vmul.f32 %v922_v9, %v629_v5  ;;  %v654_v6 = vpop.permute.xlu0 %653 }
  0xf4   :  { %v876_v14 = vpop.f32.mrf.mxu0  ;;  %v924_v15 = vpop.f32.mrf.mxu1 }
  0xf5   :  { %v733_v17 = vadd.f32 %v1337_v40, %v694_v12  ;;  %v749_v18 = vadd.f32 %v1337_v40, %v710_v13  ;;  %v877_v19 = vadd.f32 %v876_v14, %v875_v10  ;;  %v925_v32 = vadd.f32 %v924_v15, %v923_v11 }
  0xf6   :  { %v878_v33 = vpop.f32.mrf.mxu0  ;;  %v926_v35 = vpop.f32.mrf.mxu1 }
  0xf7   :  { %765 = vst [vmem:[%s1484_s4 + $0x18] sm:$0xff] %v733_v17  ;;  %781 = vst [vmem:[%s1484_s4 + $0x98] sm:$0xff] %v749_v18  ;;  %v695_v20 = vmul.f32 %v877_v19, %v1310_v21  ;;  %v711_v36 = vmul.f32 %v925_v32, %v634_v16  ;;  %v659_v16 = vpop.permute.xlu1 %658 }
  0xf8   :  { %v879_v37 = vpop.f32.mrf.mxu0  ;;  %v927_v38 = vpop.f32.mrf.mxu1 }
  0xf9   :  { %v734_v41 = vadd.f32 %v1337_v40, %v695_v20  ;;  %v750_v42 = vadd.f32 %v1337_v40, %v711_v36  ;;  %v880_v43 = vadd.f32 %v879_v37, %v878_v33  ;;  %v928_v44 = vadd.f32 %v927_v38, %v926_v35  ;;  %v664_v38 = vpop.permute.xlu0 %663 }
  0xfa   :  { %v881_v45 = vpop.f32.mrf.mxu0  ;;  %v929_v46 = vpop.f32.mrf.mxu1 }
  0xfb   :  { %766 = vst [vmem:[%s1484_s4 + $0x20] sm:$0xff] %v734_v41  ;;  %782 = vst [vmem:[%s1484_s4 + $0xa0] sm:$0xff] %v750_v42  ;;  %v696_v21 = vmul.f32 %v880_v43, %v1312_v22  ;;  %v712_v47 = vmul.f32 %v928_v44, %v639_v39 }
  0xfc   :  { %v882_v48 = vpop.f32.mrf.mxu0  ;;  %v930_v49 = vpop.f32.mrf.mxu1 }
  0xfd   :  { %v735_v51 = vadd.f32 %v1337_v40, %v696_v21  ;;  %v751_v52 = vadd.f32 %v1337_v40, %v712_v47  ;;  %v883_v53 = vadd.f32 %v882_v48, %v881_v45  ;;  %v931_v54 = vadd.f32 %v930_v49, %v929_v46  ;;  %v669_v48 = vpop.permute.xlu1 %668 }
  0xfe   :  { %v884_v55 = vpop.f32.mrf.mxu0  ;;  %v932_v56 = vpop.f32.mrf.mxu1 }
  0xff   :  { %767 = vst [vmem:[%s1484_s4 + $0x28] sm:$0xff] %v735_v51  ;;  %783 = vst [vmem:[%s1484_s4 + $0xa8] sm:$0xff] %v751_v52  ;;  %v697_v22 = vmul.f32 %v883_v53, %v1314_v23  ;;  %v713_v57 = vmul.f32 %v931_v54, %v644_v50 }
 0x100   :  { %v885_v58 = vpop.f32.mrf.mxu0  ;;  %v933_v59 = vpop.f32.mrf.mxu1 }
 0x101   :  { %v736_v61 = vadd.f32 %v1337_v40, %v697_v22  ;;  %v752_v62 = vadd.f32 %v1337_v40, %v713_v57  ;;  %v886_v63 = vadd.f32 %v885_v58, %v884_v55  ;;  %v934_v0 = vadd.f32 %v933_v59, %v932_v56  ;;  %v674_v57 = vpop.permute.xlu0 %673 }
 0x102   :  { %v887_v1 = vpop.f32.mrf.mxu0  ;;  %v935_v2 = vpop.f32.mrf.mxu1 }
 0x103   :  { %768 = vst [vmem:[%s1484_s4 + $0x30] sm:$0xff] %v736_v61  ;;  %784 = vst [vmem:[%s1484_s4 + $0xb0] sm:$0xff] %v752_v62  ;;  %v698_v23 = vmul.f32 %v886_v63, %v1316_v24  ;;  %v714_v3 = vmul.f32 %v934_v0, %v649_v60 }
 0x104   :  { %v888_v4 = vpop.f32.mrf.mxu0  ;;  %v936_v5 = vpop.f32.mrf.mxu1 }
 0x105   :  { %v737_v7 = vadd.f32 %v1337_v40, %v698_v23  ;;  %v753_v8 = vadd.f32 %v1337_v40, %v714_v3  ;;  %v889_v9 = vadd.f32 %v888_v4, %v887_v1  ;;  %v937_v10 = vadd.f32 %v936_v5, %v935_v2  ;;  %v679_v23 = vpop.permute.xlu1 %678 }
 0x106   :  { %v890_v11 = vpop.f32.mrf.mxu0  ;;  %v938_v12 = vpop.f32.mrf.mxu1 }
 0x107   :  { %769 = vst [vmem:[%s1484_s4 + $0x38] sm:$0xff] %v737_v7  ;;  %785 = vst [vmem:[%s1484_s4 + $0xb8] sm:$0xff] %v753_v8  ;;  %v699_v24 = vmul.f32 %v889_v9, %v1318_v25  ;;  %v715_v13 = vmul.f32 %v937_v10, %v654_v6 }
 0x108   :  { %v891_v14 = vpop.f32.mrf.mxu0  ;;  %v939_v15 = vpop.f32.mrf.mxu1 }
 0x109   :  { %v738_v17 = vadd.f32 %v1337_v40, %v699_v24  ;;  %v754_v18 = vadd.f32 %v1337_v40, %v715_v13  ;;  %v892_v19 = vadd.f32 %v891_v14, %v890_v11  ;;  %v940_v32 = vadd.f32 %v939_v15, %v938_v12  ;;  %v684_v12 = vpop.permute.xlu0 %683 }
 0x10a   :  { %v893_v33 = vpop.f32.mrf.mxu0  ;;  %v941_v35 = vpop.f32.mrf.mxu1 }
 0x10b   :  { %770 = vst [vmem:[%s1484_s4 + $0x40] sm:$0xff] %v738_v17  ;;  %786 = vst [vmem:[%s1484_s4 + $0xc0] sm:$0xff] %v754_v18  ;;  %v700_v25 = vmul.f32 %v892_v19, %v1320_v26  ;;  %v716_v20 = vmul.f32 %v940_v32, %v659_v16 }
 0x10c   :  { %v894_v36 = vpop.f32.mrf.mxu0  ;;  %v942_v37 = vpop.f32.mrf.mxu1 }
 0x10d   :  { %v739_v39 = vadd.f32 %v1337_v40, %v700_v25  ;;  %v755_v41 = vadd.f32 %v1337_v40, %v716_v20  ;;  %v895_v42 = vadd.f32 %v894_v36, %v893_v33  ;;  %v943_v43 = vadd.f32 %v942_v37, %v941_v35  ;;  %v689_v36 = vpop.permute.xlu1 %688 }
 0x10e   :  { %v896_v44 = vpop.f32.mrf.mxu0  ;;  %v944_v45 = vpop.f32.mrf.mxu1 }
 0x10f   :  { %771 = vst [vmem:[%s1484_s4 + $0x48] sm:$0xff] %v739_v39  ;;  %787 = vst [vmem:[%s1484_s4 + $0xc8] sm:$0xff] %v755_v41  ;;  %v701_v26 = vmul.f32 %v895_v42, %v1322_v27  ;;  %v717_v46 = vmul.f32 %v943_v43, %v664_v38 }
 0x110   :  { %v897_v21 = vpop.f32.mrf.mxu0  ;;  %v945_v47 = vpop.f32.mrf.mxu1 }
 0x111   :  { %v740_v49 = vadd.f32 %v1337_v40, %v701_v26  ;;  %v756_v50 = vadd.f32 %v1337_v40, %v717_v46  ;;  %v898_v51 = vadd.f32 %v897_v21, %v896_v44  ;;  %v946_v52 = vadd.f32 %v945_v47, %v944_v45 }
 0x112   :  { %v899_v53 = vpop.f32.mrf.mxu0  ;;  %v947_v54 = vpop.f32.mrf.mxu1 }
 0x113   :  { %772 = vst [vmem:[%s1484_s4 + $0x50] sm:$0xff] %v740_v49  ;;  %788 = vst [vmem:[%s1484_s4 + $0xd0] sm:$0xff] %v756_v50  ;;  %v702_v27 = vmul.f32 %v898_v51, %v1324_v28  ;;  %v718_v55 = vmul.f32 %v946_v52, %v669_v48 }
 0x114   :  { %v900_v56 = vpop.f32.mrf.mxu0  ;;  %v948_v22 = vpop.f32.mrf.mxu1 }
 0x115   :  { %v741_v58 = vadd.f32 %v1337_v40, %v702_v27  ;;  %v757_v59 = vadd.f32 %v1337_v40, %v718_v55  ;;  %v901_v60 = vadd.f32 %v900_v56, %v899_v53  ;;  %v949_v61 = vadd.f32 %v948_v22, %v947_v54 }
 0x116   :  { %v902_v62 = vpop.f32.mrf.mxu0  ;;  %v950_v63 = vpop.f32.mrf.mxu1 }
 0x117   :  { %773 = vst [vmem:[%s1484_s4 + $0x58] sm:$0xff] %v741_v58  ;;  %789 = vst [vmem:[%s1484_s4 + $0xd8] sm:$0xff] %v757_v59  ;;  %v703_v28 = vmul.f32 %v901_v60, %v1326_v29  ;;  %v719_v0 = vmul.f32 %v949_v61, %v674_v57 }
 0x118   :  { %v903_v1 = vpop.f32.mrf.mxu0  ;;  %v951_v2 = vpop.f32.mrf.mxu1 }
 0x119   :  { %v742_v3 = vadd.f32 %v1337_v40, %v703_v28  ;;  %v758_v4 = vadd.f32 %v1337_v40, %v719_v0  ;;  %v904_v5 = vadd.f32 %v903_v1, %v902_v62  ;;  %v952_v6 = vadd.f32 %v951_v2, %v950_v63 }
 0x11a   :  { %v905_v7 = vpop.f32.mrf.mxu0  ;;  %v953_v8 = vpop.f32.mrf.mxu1 }
 0x11b   :  { %774 = vst [vmem:[%s1484_s4 + $0x60] sm:$0xff] %v742_v3  ;;  %790 = vst [vmem:[%s1484_s4 + $0xe0] sm:$0xff] %v758_v4  ;;  %v704_v29 = vmul.f32 %v904_v5, %v1328_v30  ;;  %v720_v9 = vmul.f32 %v952_v6, %v679_v23 }
 0x11c   :  { %v906_v10 = vpop.f32.mrf.mxu0  ;;  %v954_v11 = vpop.f32.mrf.mxu1 }
 0x11d   :  { %v743_v24 = vadd.f32 %v1337_v40, %v704_v29  ;;  %v759_v13 = vadd.f32 %v1337_v40, %v720_v9  ;;  %v907_v14 = vadd.f32 %v906_v10, %v905_v7  ;;  %v955_v15 = vadd.f32 %v954_v11, %v953_v8 }
 0x11e   :  { %v908_v16 = vpop.f32.mrf.mxu0  ;;  %v956_v17 = vpop.f32.mrf.mxu1 }
 0x11f   :  { %775 = vst [vmem:[%s1484_s4 + $0x68] sm:$0xff] %v743_v24  ;;  %791 = vst [vmem:[%s1484_s4 + $0xe8] sm:$0xff] %v759_v13  ;;  %v705_v30 = vmul.f32 %v907_v14, %v1330_v31  ;;  %v721_v18 = vmul.f32 %v955_v15, %v684_v12 }
 0x120   :  { %v909_v19 = vpop.f32.mrf.mxu0  ;;  %v957_v32 = vpop.f32.mrf.mxu1 }
 0x121   :  { %v744_v33 = vadd.f32 %v1337_v40, %v705_v30  ;;  %v760_v35 = vadd.f32 %v1337_v40, %v721_v18  ;;  %v910_v25 = vadd.f32 %v909_v19, %v908_v16  ;;  %v958_v20 = vadd.f32 %v957_v32, %v956_v17 }
 0x123   :  { %776 = vst [vmem:[%s1484_s4 + $0x70] sm:$0xff] %v744_v33  ;;  %792 = vst [vmem:[%s1484_s4 + $0xf0] sm:$0xff] %v760_v35  ;;  %v706_v31 = vmul.f32 %v910_v25, %v1332_v34  ;;  %v722_v37 = vmul.f32 %v958_v20, %v689_v36 }
 0x125   :  { %v745_v38 = vadd.f32 %v1337_v40, %v706_v31  ;;  %v761_v39 = vadd.f32 %v1337_v40, %v722_v37 }
 0x127   :  { %777 = vst [vmem:[%s1484_s4 + $0x78] sm:$0xff] %v745_v38  ;;  %793 = vst [vmem:[%s1484_s4 + $0xf8] sm:$0xff] %v761_v39 }

</bundles_post_ra>
